<compile_context>
chip_gen: v7x
topology: tpu7x:2x2x1
jax: 0.10.0
libtpu: 0.0.40
codegen_flags: <defaults>
</compile_context>

<pallas_src>
import functools

import jax
import jax.numpy as jnp
from jax.experimental import pallas as pl
from jax.experimental.pallas import tpu as pltpu

NEGATIVE_SLOPE = 1.0 / 100.0
HIDDEN = (400, 300)
H1, H2 = HIDDEN
HP = 512  # hidden-1 padded to a multiple of 128 lanes (400 -> 512)


def _round_up(x, m):
    return (x + m - 1) // m * m


def _leaky_relu(x):
    return jnp.where(x > 0, x, NEGATIVE_SLOPE * x)


def critic_kernel(sa_ref, w14_ref, b14_ref, w25_ref, b25_ref,
                  w36_ref, b36_ref, q_ref):
    """One batch tile of the twin-Q MLP; all weights VMEM-resident."""
    sa = sa_ref[...]                                   # bf16 [TB, in_dim]

    # ---- layer 1, BOTH heads fused, single K=in_dim matmul: [TB, 2*HP] ----
    hg = _leaky_relu(
        jnp.dot(sa, w14_ref[...], preferred_element_type=jnp.float32)
        + b14_ref[...]
    ).astype(jnp.bfloat16)                             # cast once, then slice

    hp = w25_ref.shape[1]                              # 128-aligned lane split
    h1 = hg[:, :hp]
    g1 = hg[:, hp:]

    # ---- layer 2: one MXU matmul per head ----------------------------------
    h2 = _leaky_relu(
        jnp.dot(h1, w25_ref[0], preferred_element_type=jnp.float32)
        + b25_ref[0]).astype(jnp.bfloat16)
    g2 = _leaky_relu(
        jnp.dot(g1, w25_ref[1], preferred_element_type=jnp.float32)
        + b25_ref[1]).astype(jnp.bfloat16)

    # ---- layer 3 on the MXU: [TB,H2]@[H2,2] per head, other column zero ----
    q = (jnp.dot(h2, w36_ref[0], preferred_element_type=jnp.float32)
         + jnp.dot(g2, w36_ref[1], preferred_element_type=jnp.float32)
         + b36_ref[...])
    q_ref[...] = q.astype(q_ref.dtype)


def init_critic_params(key, state_dim, action_dim):
    """PyTorch-equivalent params: W stored [in, out], b stored [1, out].

    Matches nn.Linear default init U(-1/sqrt(fan_in), 1/sqrt(fan_in)).
    """
    in_dim = state_dim + action_dim
    sizes = [
        ("w1", "b1", in_dim, H1), ("w2", "b2", H1, H2), ("w3", "b3", H2, 1),
        ("w4", "b4", in_dim, H1), ("w5", "b5", H1, H2), ("w6", "b6", H2, 1),
    ]
    params = {}
    keys = jax.random.split(key, 2 * len(sizes))
    for i, (wn, bn, fan_in, fan_out) in enumerate(sizes):
        bound = 1.0 / float(fan_in) ** 0.5
        params[wn] = jax.random.uniform(
            keys[2 * i], (fan_in, fan_out), jnp.float32, -bound, bound)
        params[bn] = jax.random.uniform(
            keys[2 * i + 1], (1, fan_out), jnp.float32, -bound, bound)
    return params


def pack_critic_params(params, state_dim, action_dim, weight_dtype=jnp.bfloat16):
    """Packs/pads the canonical params into 6 kernel buffers (one-time cost)."""
    in_dim = state_dim + action_dim

    # Fused, lane-padded layer-1 weights/bias for both heads: [in_dim, 2*HP].
    # (kept UNSPLIT -> kernel does a single K=in_dim matmul)
    w14 = jnp.zeros((in_dim, 2 * HP), jnp.float32)
    w14 = w14.at[:, :H1].set(params["w1"]).at[:, HP:HP + H1].set(params["w4"])
    b14 = jnp.zeros((1, 2 * HP), jnp.float32)
    b14 = b14.at[:, :H1].set(params["b1"]).at[:, HP:HP + H1].set(params["b4"])
    w14 = w14.astype(weight_dtype)

    # Layer-2 weights, K zero-padded 400 -> 512 (padded lanes contribute 0).
    w2p = jnp.zeros((HP, H2), jnp.float32).at[:H1].set(params["w2"])
    w5p = jnp.zeros((HP, H2), jnp.float32).at[:H1].set(params["w5"])
    w25 = jnp.stack([w2p, w5p]).astype(weight_dtype)              # [2, HP, H2]
    b25 = jnp.stack([params["b2"], params["b5"]])                 # [2, 1, H2]

    # Layer-3 weights as [H2, 2] per head with the *other* head's column zero,
    # so the kernel's two tiny MXU matmuls sum directly into the [TB,2] output.
    w3c = jnp.zeros((H2, 2), jnp.float32).at[:, 0:1].set(params["w3"])
    w6c = jnp.zeros((H2, 2), jnp.float32).at[:, 1:2].set(params["w6"])
    w36 = jnp.stack([w3c, w6c]).astype(weight_dtype)              # [2, H2, 2]
    b36 = jnp.concatenate([params["b3"], params["b6"]], axis=-1)  # [1, 2]

    return {"w14": w14, "b14": b14, "w25": w25, "b25": b25,
            "w36": w36, "b36": b36}


def _choose_tile(batch, tile_batch):
    """Batch tile: multiple of 16 (bf16 sublane packing), capped at tile_batch,
    and >=2 grid iterations as soon as the batch allows (v7x dual-TC)."""
    half = _round_up(-(-batch // 2), 16)
    tb = max(16, min(tile_batch, half))
    pb = _round_up(batch, tb)
    return tb, pb


@functools.partial(jax.jit, static_argnames=("tile_batch",))
def critic_forward(state, action, packed, tile_batch=1024):
    """Returns (q1, q2), each [batch, 1] float32."""
    B, S = state.shape
    A = action.shape[1]
    in_dim = S + A

    # Pre-concatenated bf16 state|action slab -> single K=in_dim layer-1 DMA.
    sa = jnp.concatenate([state, action], axis=-1).astype(jnp.bfloat16)

    TB, PB = _choose_tile(B, tile_batch)
    if PB != B:
        sa = jnp.pad(sa, ((0, PB - B), (0, 0)))

    w14, b14 = packed["w14"], packed["b14"]
    w25, b25 = packed["w25"], packed["b25"]
    w36, b36 = packed["w36"], packed["b36"]

    flat = (sa, w14, b14, w25, b25, w36, b36)
    flops = 2 * PB * (in_dim * 2 * HP + 2 * HP * H2 + 2 * H2 * 2)
    bytes_accessed = int(sum(x.size * x.dtype.itemsize for x in flat)
                         + PB * 2 * 4)

    q = pl.pallas_call(
        critic_kernel,
        grid=(PB // TB,),
        in_specs=[
            pl.BlockSpec((TB, in_dim), lambda i: (i, 0)),   # activation tile
            pl.BlockSpec(w14.shape, lambda i: (0, 0)),      # weights stay
            pl.BlockSpec(b14.shape, lambda i: (0, 0)),      # VMEM-resident
            pl.BlockSpec(w25.shape, lambda i: (0, 0, 0)),   # across the grid
            pl.BlockSpec(b25.shape, lambda i: (0, 0, 0)),
            pl.BlockSpec(w36.shape, lambda i: (0, 0, 0)),
            pl.BlockSpec(b36.shape, lambda i: (0, 0)),
        ],
        out_specs=pl.BlockSpec((TB, 2), lambda i: (i, 0)),
        out_shape=jax.ShapeDtypeStruct((PB, 2), jnp.float32),
        compiler_params=pltpu.CompilerParams(
            dimension_semantics=("parallel",)),
        cost_estimate=pl.CostEstimate(
            flops=flops, transcendentals=0, bytes_accessed=bytes_accessed),
    )(*flat)

    q = q[:B]
    return q[:, 0:1], q[:, 1:2]


def critic_forward_ref(state, action, params):
    """Exact f32 reference matching the PyTorch module."""
    sa = jnp.concatenate([state, action], axis=-1)
    h = _leaky_relu(sa @ params["w1"] + params["b1"])
    h = _leaky_relu(h @ params["w2"] + params["b2"])
    q1 = h @ params["w3"] + params["b3"]
    g = _leaky_relu(sa @ params["w4"] + params["b4"])
    g = _leaky_relu(g @ params["w5"] + params["b5"])
    q2 = g @ params["w6"] + params["b6"]
    return q1, q2


def critic_forward_ref_packed(state, action, packed):
    """Pure-JAX reference mirroring the kernel's bf16-weight/activation path."""
    sa = jnp.concatenate([state, action], axis=-1).astype(jnp.bfloat16)
    hg = _leaky_relu(
        jnp.dot(sa, packed["w14"], preferred_element_type=jnp.float32)
        + packed["b14"]).astype(jnp.bfloat16)
    h1, g1 = hg[:, :HP], hg[:, HP:]
    h2 = _leaky_relu(
        jnp.dot(h1, packed["w25"][0], preferred_element_type=jnp.float32)
        + packed["b25"][0]).astype(jnp.bfloat16)
    g2 = _leaky_relu(
        jnp.dot(g1, packed["w25"][1], preferred_element_type=jnp.float32)
        + packed["b25"][1]).astype(jnp.bfloat16)
    q = (jnp.dot(h2, packed["w36"][0], preferred_element_type=jnp.float32)
         + jnp.dot(g2, packed["w36"][1], preferred_element_type=jnp.float32)
         + packed["b36"])
    return q[:, 0:1], q[:, 1:2]


if __name__ == "__main__":
    state_dim, action_dim, batch = 12, 4, 6

    key = jax.random.PRNGKey(0)
    kp, ks, ka = jax.random.split(key, 3)
    params = init_critic_params(kp, state_dim, action_dim)
    packed = pack_critic_params(params, state_dim, action_dim)

    state = jax.random.normal(ks, (batch, state_dim), jnp.float32)
    action = jax.random.normal(ka, (batch, action_dim), jnp.float32)

    q1, q2 = critic_forward(state, action, packed)
    jax.block_until_ready((q1, q2))

    assert q1.shape == (batch, 1) and q2.shape == (batch, 1)

    # Tight check vs. a reference with identical bf16-weight / f32-acc numerics.
    q1_p, q2_p = critic_forward_ref_packed(state, action, packed)
    assert jnp.allclose(q1, q1_p, atol=5e-3, rtol=5e-3)
    assert jnp.allclose(q2, q2_p, atol=5e-3, rtol=5e-3)

    # Loose check vs. the exact f32 PyTorch-semantics reference
    # (difference is only bf16 weight/activation rounding).
    q1_f, q2_f = critic_forward_ref(state, action, params)
    assert jnp.allclose(q1, q1_f, atol=5e-2, rtol=5e-2)
    assert jnp.allclose(q2, q2_f, atol=5e-2, rtol=5e-2)

    print("KERNEL_OK")
</pallas_src>

<mosaic_0001>
module attributes {stable_mosaic.version = 11 : i64} {
  func.func @critic_kernel(%arg0: i32, %arg1: memref<16x16xbf16, #tpu.memory_space<vmem>>, %arg2: memref<16x1024xbf16, #tpu.memory_space<vmem>>, %arg3: memref<1x1024xf32, #tpu.memory_space<vmem>>, %arg4: memref<2x512x300xbf16, #tpu.memory_space<vmem>>, %arg5: memref<2x1x300xf32, #tpu.memory_space<vmem>>, %arg6: memref<2x300x2xbf16, #tpu.memory_space<vmem>>, %arg7: memref<1x2xf32, #tpu.memory_space<vmem>>, %arg8: memref<16x2xf32, #tpu.memory_space<vmem>>) attributes {dimension_semantics = [#tpu.dimension_semantics<parallel>], iteration_bounds = array<i64: 1>, scalar_prefetch = 0 : i64, scratch_operands = 0 : i64, tpu.core_type = #tpu.core_type<tc>, window_params = [{transform_indices = @transform_0, window_bounds = array<i64: 16, 16>}, {pipeline_mode = #tpu.pipeline_mode<synchronous>, transform_indices = @transform_1, window_bounds = array<i64: 16, 1024>}, {pipeline_mode = #tpu.pipeline_mode<synchronous>, transform_indices = @transform_2, window_bounds = array<i64: 1, 1024>}, {pipeline_mode = #tpu.pipeline_mode<synchronous>, transform_indices = @transform_3, window_bounds = array<i64: 2, 512, 300>}, {pipeline_mode = #tpu.pipeline_mode<synchronous>, transform_indices = @transform_4, window_bounds = array<i64: 2, 1, 300>}, {pipeline_mode = #tpu.pipeline_mode<synchronous>, transform_indices = @transform_5, window_bounds = array<i64: 2, 300, 2>}, {pipeline_mode = #tpu.pipeline_mode<synchronous>, transform_indices = @transform_6, window_bounds = array<i64: 1, 2>}, {transform_indices = @transform_7, window_bounds = array<i64: 16, 2>}]} {
    %c0 = arith.constant 0 : index
    %c0_0 = arith.constant 0 : index
    %0 = vector.load %arg1[%c0, %c0_0] : memref<16x16xbf16, #tpu.memory_space<vmem>>, vector<16x16xbf16>
    %c0_1 = arith.constant 0 : index
    %c0_2 = arith.constant 0 : index
    %1 = vector.load %arg2[%c0_1, %c0_2] : memref<16x1024xbf16, #tpu.memory_space<vmem>>, vector<16x1024xbf16>
    %cst = arith.constant dense<0.000000e+00> : vector<16x1024xf32>
    %2 = tpu.matmul %0, %1, %cst {dimension_numbers = #tpu.dot_dimension_numbers<[1], [0], [0], [1], [0, 0, 1, 1], [], []>} : vector<16x16xbf16>, vector<16x1024xbf16>, vector<16x1024xf32> -> vector<16x1024xf32>
    %c0_3 = arith.constant 0 : index
    %c0_4 = arith.constant 0 : index
    %3 = vector.load %arg3[%c0_3, %c0_4] : memref<1x1024xf32, #tpu.memory_space<vmem>>, vector<1x1024xf32>
    %4 = vector.broadcast %3 : vector<1x1024xf32> to vector<16x1024xf32>
    %5 = arith.addf %2, %4 : vector<16x1024xf32>
    %cst_5 = arith.constant 0.000000e+00 : f32
    %6 = vector.broadcast %cst_5 : f32 to vector<16x1024xf32>
    %7 = arith.cmpf ogt, %5, %6 : vector<16x1024xf32>
    %cst_6 = arith.constant 0.00999999977 : f32
    %8 = vector.broadcast %cst_6 : f32 to vector<16x1024xf32>
    %9 = arith.mulf %8, %5 : vector<16x1024xf32>
    %10 = arith.select %7, %5, %9 : vector<16x1024xi1>, vector<16x1024xf32>
    %11 = arith.truncf %10 : vector<16x1024xf32> to vector<16x1024xbf16>
    %12 = vector.extract_strided_slice %11 {offsets = [0, 0], sizes = [16, 512], strides = [1, 1]} : vector<16x1024xbf16> to vector<16x512xbf16>
    %13 = vector.extract_strided_slice %11 {offsets = [0, 512], sizes = [16, 512], strides = [1, 1]} : vector<16x1024xbf16> to vector<16x512xbf16>
    %c0_7 = arith.constant 0 : index
    %c0_8 = arith.constant 0 : index
    %c0_9 = arith.constant 0 : index
    %14 = vector.load %arg4[%c0_7, %c0_8, %c0_9] : memref<2x512x300xbf16, #tpu.memory_space<vmem>>, vector<1x512x300xbf16>
    %15 = vector.shape_cast %14 : vector<1x512x300xbf16> to vector<512x300xbf16>
    %cst_10 = arith.constant dense<0.000000e+00> : vector<16x300xf32>
    %16 = tpu.matmul %12, %15, %cst_10 {dimension_numbers = #tpu.dot_dimension_numbers<[1], [0], [0], [1], [0, 0, 1, 1], [], []>} : vector<16x512xbf16>, vector<512x300xbf16>, vector<16x300xf32> -> vector<16x300xf32>
    %c0_11 = arith.constant 0 : index
    %c0_12 = arith.constant 0 : index
    %c0_13 = arith.constant 0 : index
    %17 = vector.load %arg5[%c0_11, %c0_12, %c0_13] : memref<2x1x300xf32, #tpu.memory_space<vmem>>, vector<1x1x300xf32>
    %18 = vector.shape_cast %17 : vector<1x1x300xf32> to vector<1x300xf32>
    %19 = vector.broadcast %18 : vector<1x300xf32> to vector<16x300xf32>
    %20 = arith.addf %16, %19 : vector<16x300xf32>
    %cst_14 = arith.constant 0.000000e+00 : f32
    %21 = vector.broadcast %cst_14 : f32 to vector<16x300xf32>
    %22 = arith.cmpf ogt, %20, %21 : vector<16x300xf32>
    %cst_15 = arith.constant 0.00999999977 : f32
    %23 = vector.broadcast %cst_15 : f32 to vector<16x300xf32>
    %24 = arith.mulf %23, %20 : vector<16x300xf32>
    %25 = arith.select %22, %20, %24 : vector<16x300xi1>, vector<16x300xf32>
    %26 = arith.truncf %25 : vector<16x300xf32> to vector<16x300xbf16>
    %c1 = arith.constant 1 : index
    %c0_16 = arith.constant 0 : index
    %c0_17 = arith.constant 0 : index
    %27 = vector.load %arg4[%c1, %c0_16, %c0_17] : memref<2x512x300xbf16, #tpu.memory_space<vmem>>, vector<1x512x300xbf16>
    %28 = vector.shape_cast %27 : vector<1x512x300xbf16> to vector<512x300xbf16>
    %cst_18 = arith.constant dense<0.000000e+00> : vector<16x300xf32>
    %29 = tpu.matmul %13, %28, %cst_18 {dimension_numbers = #tpu.dot_dimension_numbers<[1], [0], [0], [1], [0, 0, 1, 1], [], []>} : vector<16x512xbf16>, vector<512x300xbf16>, vector<16x300xf32> -> vector<16x300xf32>
    %c1_19 = arith.constant 1 : index
    %c0_20 = arith.constant 0 : index
    %c0_21 = arith.constant 0 : index
    %30 = vector.load %arg5[%c1_19, %c0_20, %c0_21] : memref<2x1x300xf32, #tpu.memory_space<vmem>>, vector<1x1x300xf32>
    %31 = vector.shape_cast %30 : vector<1x1x300xf32> to vector<1x300xf32>
    %32 = vector.broadcast %31 : vector<1x300xf32> to vector<16x300xf32>
    %33 = arith.addf %29, %32 : vector<16x300xf32>
    %cst_22 = arith.constant 0.000000e+00 : f32
    %34 = vector.broadcast %cst_22 : f32 to vector<16x300xf32>
    %35 = arith.cmpf ogt, %33, %34 : vector<16x300xf32>
    %cst_23 = arith.constant 0.00999999977 : f32
    %36 = vector.broadcast %cst_23 : f32 to vector<16x300xf32>
    %37 = arith.mulf %36, %33 : vector<16x300xf32>
    %38 = arith.select %35, %33, %37 : vector<16x300xi1>, vector<16x300xf32>
    %39 = arith.truncf %38 : vector<16x300xf32> to vector<16x300xbf16>
    %c0_24 = arith.constant 0 : index
    %c0_25 = arith.constant 0 : index
    %c0_26 = arith.constant 0 : index
    %40 = vector.load %arg6[%c0_24, %c0_25, %c0_26] : memref<2x300x2xbf16, #tpu.memory_space<vmem>>, vector<1x300x2xbf16>
    %41 = vector.shape_cast %40 : vector<1x300x2xbf16> to vector<300x2xbf16>
    %cst_27 = arith.constant dense<0.000000e+00> : vector<16x2xf32>
    %42 = tpu.matmul %26, %41, %cst_27 {dimension_numbers = #tpu.dot_dimension_numbers<[1], [0], [0], [1], [0, 0, 1, 1], [], []>} : vector<16x300xbf16>, vector<300x2xbf16>, vector<16x2xf32> -> vector<16x2xf32>
    %c1_28 = arith.constant 1 : index
    %c0_29 = arith.constant 0 : index
    %c0_30 = arith.constant 0 : index
    %43 = vector.load %arg6[%c1_28, %c0_29, %c0_30] : memref<2x300x2xbf16, #tpu.memory_space<vmem>>, vector<1x300x2xbf16>
    %44 = vector.shape_cast %43 : vector<1x300x2xbf16> to vector<300x2xbf16>
    %cst_31 = arith.constant dense<0.000000e+00> : vector<16x2xf32>
    %45 = tpu.matmul %39, %44, %cst_31 {dimension_numbers = #tpu.dot_dimension_numbers<[1], [0], [0], [1], [0, 0, 1, 1], [], []>} : vector<16x300xbf16>, vector<300x2xbf16>, vector<16x2xf32> -> vector<16x2xf32>
    %46 = arith.addf %42, %45 : vector<16x2xf32>
    %c0_32 = arith.constant 0 : index
    %c0_33 = arith.constant 0 : index
    %47 = vector.load %arg7[%c0_32, %c0_33] : memref<1x2xf32, #tpu.memory_space<vmem>>, vector<1x2xf32>
    %48 = vector.broadcast %47 : vector<1x2xf32> to vector<16x2xf32>
    %49 = arith.addf %46, %48 : vector<16x2xf32>
    %c0_34 = arith.constant 0 : index
    %c0_35 = arith.constant 0 : index
    %50 = vector.load %arg8[%c0_34, %c0_35] : memref<16x2xf32, #tpu.memory_space<vmem>>, vector<16x2xf32>
    tpu.vector_store %arg8[%c0_34, %c0_35], %49 {strides = array<i32>} : memref<16x2xf32, #tpu.memory_space<vmem>>, vector<16x2xf32>,
    return
  }
  func.func @transform_0(%arg0: i32) -> (i32, i32) {
    %c0_i32 = arith.constant 0 : i32
    %c0_i32_0 = arith.constant 0 : i32
    return %arg0, %c0_i32 : i32, i32
  }
  func.func @transform_1(%arg0: i32) -> (i32, i32) {
    %c0_i32 = arith.constant 0 : i32
    %c0_i32_0 = arith.constant 0 : i32
    %c0_i32_1 = arith.constant 0 : i32
    return %c0_i32, %c0_i32_0 : i32, i32
  }
  func.func @transform_2(%arg0: i32) -> (i32, i32) {
    %c0_i32 = arith.constant 0 : i32
    %c0_i32_0 = arith.constant 0 : i32
    %c0_i32_1 = arith.constant 0 : i32
    return %c0_i32, %c0_i32_0 : i32, i32
  }
  func.func @transform_3(%arg0: i32) -> (i32, i32, i32) {
    %c0_i32 = arith.constant 0 : i32
    %c0_i32_0 = arith.constant 0 : i32
    %c0_i32_1 = arith.constant 0 : i32
    %c0_i32_2 = arith.constant 0 : i32
    return %c0_i32, %c0_i32_0, %c0_i32_1 : i32, i32, i32
  }
  func.func @transform_4(%arg0: i32) -> (i32, i32, i32) {
    %c0_i32 = arith.constant 0 : i32
    %c0_i32_0 = arith.constant 0 : i32
    %c0_i32_1 = arith.constant 0 : i32
    %c0_i32_2 = arith.constant 0 : i32
    return %c0_i32, %c0_i32_0, %c0_i32_1 : i32, i32, i32
  }
  func.func @transform_5(%arg0: i32) -> (i32, i32, i32) {
    %c0_i32 = arith.constant 0 : i32
    %c0_i32_0 = arith.constant 0 : i32
    %c0_i32_1 = arith.constant 0 : i32
    %c0_i32_2 = arith.constant 0 : i32
    return %c0_i32, %c0_i32_0, %c0_i32_1 : i32, i32, i32
  }
  func.func @transform_6(%arg0: i32) -> (i32, i32) {
    %c0_i32 = arith.constant 0 : i32
    %c0_i32_0 = arith.constant 0 : i32
    %c0_i32_1 = arith.constant 0 : i32
    return %c0_i32, %c0_i32_0 : i32, i32
  }
  func.func @transform_7(%arg0: i32) -> (i32, i32) {
    %c0_i32 = arith.constant 0 : i32
    %c0_i32_0 = arith.constant 0 : i32
    return %arg0, %c0_i32 : i32, i32
  }
}

</mosaic_0001>

<bundles_post_ra>
// kernel: critic_forward.1
= control target key start
LH: loop header
LB: loop body
LE: loop exit
PB: predicated region body
PF: predicated region fallthrough
CT: control target
= control target key end

     0   :  { %v3434_v2 = vmov 0   ;;  %vm124_vm0 = vcmask 130048   ;;  %s4301_s1 = inlined_call_operand.vmem [shape: bf16[16,1024], index: 1, kind: input, shape index: {}]   ;;  %s4302_s0 = inlined_call_operand.vmem [shape: bf16[16,16], index: 0, kind: input, shape index: {}]   ;;  %s4303_s3 = inlined_call_operand.vmem [shape: bf16[2,512,300], index: 3, kind: input, shape index: {}]   ;;  %s4304_s2 = inlined_call_operand.vmem [shape: f32[1,1024], index: 2, kind: input, shape index: {}]   ;;  %s4305_s5 = inlined_call_operand.vmem [shape: bf16[2,300,2], index: 5, kind: input, shape index: {}]   ;;  %s4306_s4 = inlined_call_operand.vmem [shape: f32[2,1,300], index: 4, kind: input, shape index: {}]   ;;  %s4307_s6 = inlined_call_operand.vmem [shape: f32[1,2], index: 6, kind: input, shape index: {}]   ;;  %s4308_s7 = inlined_call_operand.vmem [shape: f32[16,2], index: 7, kind: output, shape index: {}]  }
   0x1   :  { %v29_v0 = vld [vmem:[%s4301_s1] sm:$0xff]  ;;  %160 = vmatprep.mubr.bf16.mxu0 %v3434_v2  ;;  %203 = vmatprep.mubr.bf16.mxu1 %v3434_v2  ;;  %v30_v6 = vld [vmem:[%s4301_s1 + $0x8] sm:$0xff]  ;;  %v31_v8 = vld [vmem:[%s4301_s1 + $0x10] sm:$0xff] }
   0x2   :  { %v33_v1 = vld [vmem:[%s4301_s1 + $0x20] sm:$0xff]  ;;  %v34_v7 = vld [vmem:[%s4301_s1 + $0x28] sm:$0xff]  ;;  %v35_v9 = vld [vmem:[%s4301_s1 + $0x30] sm:$0xff] }
   0x3   :  { %v2549_v3 = vcombine.high %v29_v0, %v33_v1  ;;  %v2548_v4 = vcombine.low %v29_v0, %v33_v1  ;;  %v3139_v5 = vld [vmem:[%s4302_s0] sm:$0xff]   ;;  %v2551_v10 = vcombine.high %v30_v6, %v34_v7  ;;  %v2550_v11 = vcombine.low %v30_v6, %v34_v7  ;;  %v32_v13 = vld [vmem:[%s4301_s1 + $0x18] sm:$0xff]  ;;  %v3167_v23 = vld [vmem:[%s4303_s3 + $0xc8] ss:$12 sps:$4 sm:$0xff]  }
   0x4   :  { %v2553_v12 = vcombine.high %v31_v8, %v35_v9  ;;  %v36_v14 = vld [vmem:[%s4301_s1 + $0x38] sm:$0xff]  ;;  %v2552_v15 = vcombine.low %v31_v8, %v35_v9  ;;  %v3142_v17 = vld [vmem:[%s4303_s3 + $0x4] ss:$12 sps:$4 sm:$0xff]   ;;  %v3140_v19 = vld [vmem:[%s4303_s3] ss:$12 sps:$4 sm:$0xff]  }
   0x5   :  { %128 = vmatprep.subr.bf16.mxu0 %v2549_v3  ;;  %v2555_v16 = vcombine.high %v32_v13, %v36_v14  ;;  %171 = vmatprep.subr.bf16.mxu1 %v2551_v10  ;;  %v2554_v18 = vcombine.low %v32_v13, %v36_v14  ;;  %v3145_v20 = vld [vmem:[%s4303_s3 + $0x1c] ss:$12 sps:$4 sm:$0xff]   ;;  %v3143_v21 = vld [vmem:[%s4303_s3 + $0x18] ss:$12 sps:$4 sm:$0xff]   ;;  %v3148_v22 = vld [vmem:[%s4303_s3 + $0x34] ss:$12 sps:$4 sm:$0xff]  }
   0x6   :  { %129 = vmatpush1.bf16.msra.mxu0 %v2548_v4  ;;  %172 = vmatpush1.bf16.msra.mxu1 %v2550_v11  ;;  %v3168_v24 = vld [vmem:[%s4303_s3 + $0x8] ss:$12 sps:$4 sm:$0xff]   ;;  %v3146_v25 = vld [vmem:[%s4303_s3 + $0x30] ss:$12 sps:$4 sm:$0xff]   ;;  %v3172_v26 = vld [vmem:[%s4303_s3 + $0xe0] ss:$12 sps:$4 sm:$0xff]   ;;  %v39_v4 = vlaneseq }
   0x7   :  { %214 = vmatprep.subr.bf16.mxu0 %v2553_v12  ;;  %257 = vmatprep.subr.bf16.mxu1 %v2555_v16  ;;  %v3173_v27 = vld [vmem:[%s4303_s3 + $0x20] ss:$12 sps:$4 sm:$0xff]   ;;  %v3149_v29 = vld [vmem:[%s4303_s3 + $0x48] ss:$12 sps:$4 sm:$0xff]   ;;  %v3177_v30 = vld [vmem:[%s4303_s3 + $0xf8] ss:$12 sps:$4 sm:$0xff]  }
   0x8   :  { %v3151_v28 = vld [vmem:[%s4303_s3 + $0x4c] ss:$12 sps:$4 sm:$0xff]   ;;  %v3154_v32 = vld [vmem:[%s4303_s3 + $0x64] ss:$12 sps:$4 sm:$0xff]   ;;  %v3157_v36 = vld [vmem:[%s4303_s3 + $0x7c] ss:$12 sps:$4 sm:$0xff]  }
   0x9   :  { %2556 = vmatmul.mubr.msk.bf16.vlgmr.msra.gmra.mrb[0].mxu0 %vm124_vm0, %v3139_v5  ;;  %2557 = vmatmul.mubr.msk.bf16.vlgmr.msra.gmra.mrb[0].mxu1 %vm124_vm0, %v3139_v5  ;;  %v3178_v31 = vld [vmem:[%s4303_s3 + $0x38] ss:$12 sps:$4 sm:$0xff]   ;;  %v3182_v33 = vld [vmem:[%s4303_s3 + $0x110] ss:$12 sps:$4 sm:$0xff]   ;;  %v3152_v35 = vld [vmem:[%s4303_s3 + $0x60] ss:$12 sps:$4 sm:$0xff]  }
   0xa   :  { %215 = vmatpush1.bf16.msra.mxu0 %v2552_v15  ;;  %246 = vmatprep.mubr.bf16.mxu0 %v3434_v2  ;;  %v3183_v34 = vld [vmem:[%s4303_s3 + $0x50] ss:$12 sps:$4 sm:$0xff]   ;;  %v3187_v37 = vld [vmem:[%s4303_s3 + $0x128] ss:$12 sps:$4 sm:$0xff]   ;;  %v3155_v39 = vld [vmem:[%s4303_s3 + $0x78] ss:$12 sps:$4 sm:$0xff]  }
   0xb   :  { %1013 = vmatprep.subr.bf16.mxu0 %v3142_v17  ;;  %258 = vmatpush1.bf16.msra.mxu1 %v2554_v18  ;;  %v3188_v38 = vld [vmem:[%s4303_s3 + $0x68] ss:$12 sps:$4 sm:$0xff]   ;;  %v3192_v41 = vld [vmem:[%s4303_s3 + $0x140] ss:$12 sps:$4 sm:$0xff]   ;;  %v3158_v42 = vld [vmem:[%s4303_s3 + $0x90] ss:$12 sps:$4 sm:$0xff]  }
   0xc   :  { %289 = vmatprep.mubr.bf16.mxu1 %v3434_v2  ;;  %2960 = vmatprep.subr.bf16.mxu1 %v3167_v23  ;;  %v3160_v40 = vld [vmem:[%s4303_s3 + $0x94] ss:$12 sps:$4 sm:$0xff]   ;;  %v3163_v43 = vld [vmem:[%s4303_s3 + $0xac] ss:$12 sps:$4 sm:$0xff]   ;;  %v3166_v45 = vld [vmem:[%s4303_s3 + $0xc4] ss:$12 sps:$4 sm:$0xff]  }
   0xd   :  { %v3161_v44 = vld [vmem:[%s4303_s3 + $0xa8] ss:$12 sps:$4 sm:$0xff]   ;;  %v3164_v46 = vld [vmem:[%s4303_s3 + $0xc0] ss:$12 sps:$4 sm:$0xff]   ;;  %v3169_v48 = vld [vmem:[%s4303_s3 + $0xd8] ss:$12 sps:$4 sm:$0xff]  }
   0xe   :  { %v3171_v47 = vld [vmem:[%s4303_s3 + $0xdc] ss:$12 sps:$4 sm:$0xff]   ;;  %v3176_v49 = vld [vmem:[%s4303_s3 + $0xf4] ss:$12 sps:$4 sm:$0xff]   ;;  %v3181_v51 = vld [vmem:[%s4303_s3 + $0x10c] ss:$12 sps:$4 sm:$0xff]  }
   0xf   :  { %v3174_v50 = vld [vmem:[%s4303_s3 + $0xf0] ss:$12 sps:$4 sm:$0xff]   ;;  %v3179_v52 = vld [vmem:[%s4303_s3 + $0x108] ss:$12 sps:$4 sm:$0xff]   ;;  %v3184_v54 = vld [vmem:[%s4303_s3 + $0x120] ss:$12 sps:$4 sm:$0xff]  }
  0x10   :  { %v3186_v53 = vld [vmem:[%s4303_s3 + $0x124] ss:$12 sps:$4 sm:$0xff]   ;;  %v3191_v55 = vld [vmem:[%s4303_s3 + $0x13c] ss:$12 sps:$4 sm:$0xff]   ;;  %v3193_v57 = vld [vmem:[%s4303_s3 + $0x80] ss:$12 sps:$4 sm:$0xff]  }
  0x11   :  { %2558 = vmatmul.mubr.msk.bf16.vlgmr.msra.gmra.mrb[4].mxu0 %vm124_vm0, %v3139_v5  ;;  %2559 = vmatmul.mubr.msk.bf16.vlgmr.msra.gmra.mrb[4].mxu1 %vm124_vm0, %v3139_v5  ;;  %v3189_v56 = vld [vmem:[%s4303_s3 + $0x138] ss:$12 sps:$4 sm:$0xff]   ;;  %v3196_v58 = vld [vmem:[%s4303_s3 + $0x154] ss:$12 sps:$4 sm:$0xff]   ;;  %v3194_v60 = vld [vmem:[%s4303_s3 + $0x150] ss:$12 sps:$4 sm:$0xff]  }
  0x12   :  { %1014 = vmatpush1.bf16.msra.mxu0 %v3140_v19  ;;  %2961 = vmatpush3.bf16.msra.mxu1 %v3168_v24  ;;  %v3197_v59 = vld [vmem:[%s4303_s3 + $0x158] ss:$12 sps:$4 sm:$0xff]   ;;  %v3202_v63 = vld [vmem:[%s4303_s3 + $0x170] ss:$12 sps:$4 sm:$0xff]   ;;  %v3199_v0 = vld [vmem:[%s4303_s3 + $0x168] ss:$12 sps:$4 sm:$0xff]  }
  0x13   :  { %1015 = vmatprep.subr.bf16.mxu0 %v3145_v20  ;;  %2962 = vmatprep.subr.bf16.mxu1 %v3172_v26  ;;  %v3198_v61 = vld [vmem:[%s4303_s3 + $0x98] ss:$12 sps:$4 sm:$0xff]   ;;  %v3203_v1 = vld [vmem:[%s4303_s3 + $0xb0] ss:$12 sps:$4 sm:$0xff]   ;;  %v3207_v3 = vld [vmem:[%s4303_s3 + $0x248] ss:$12 sps:$4 sm:$0xff]  }
  0x14   :  { %v3201_v62 = vld [vmem:[%s4303_s3 + $0x16c] ss:$12 sps:$4 sm:$0xff]   ;;  %v3206_v2 = vld [vmem:[%s4303_s3 + $0x184] ss:$12 sps:$4 sm:$0xff]   ;;  %v40_v5 = vshrl.u32 %v39_v4, 7 }
  0x15   :  { %v37_v7 = vld [vmem:[%s4304_s2] sm:$0xff] }
  0x16   :  { %1016 = vmatpush1.bf16.msra.mxu0 %v3143_v21  ;;  %2963 = vmatpush3.bf16.msra.mxu1 %v3173_v27  ;;  %v3658_v6 = vsub.s32 0, %v40_v5  ;;  %v3663_v8 = vsub.s32 1, %v40_v5  ;;  %v3665_v9 = vsub.s32 2, %v40_v5  ;;  %v53_v10 = vsub.s32 3, %v40_v5 }
  0x17   :  { %1017 = vmatprep.subr.bf16.mxu0 %v3148_v22  ;;  %2964 = vmatprep.subr.bf16.mxu1 %v3177_v30  ;;  %v57_v12 = vsub.s32 4, %v40_v5  ;;  %v61_v14 = vsub.s32 5, %v40_v5  ;;  %v65_v15 = vsub.s32 6, %v40_v5  ;;  %v69_v16 = vsub.s32 7, %v40_v5 }
  0x18   :  { %v42_v11 = vrot.slane %v37_v7, %v3658_v6  ;;  %v46_v13 = vrot.slane %v37_v7, %v3663_v8  ;;  %v50_v17 = vrot.slane %v37_v7, %v3665_v9  ;;  %v54_v19 = vrot.slane %v37_v7, %v53_v10 }
  0x19   :  { %v58_v22 = vrot.slane %v37_v7, %v57_v12  ;;  %v3670_v26 = vrot.slane %v37_v7, %v61_v14  ;;  %v3672_v27 = vrot.slane %v37_v7, %v65_v15 }
  0x1a   :  { %1018 = vmatpush1.bf16.msra.mxu0 %v3146_v25  ;;  %2965 = vmatpush3.bf16.msra.mxu1 %v3178_v31 }
  0x1b   :  { %1019 = vmatprep.subr.bf16.mxu0 %v3151_v28  ;;  %2966 = vmatprep.subr.bf16.mxu1 %v3182_v33  ;;  %v3674_v28 = vrot.slane %v37_v7, %v69_v16 }
  0x1e   :  { %1020 = vmatpush1.bf16.msra.mxu0 %v3149_v29  ;;  %2967 = vmatpush3.bf16.msra.mxu1 %v3183_v34 }
  0x1f   :  { %1021 = vmatprep.subr.bf16.mxu0 %v3154_v32  ;;  %2968 = vmatprep.subr.bf16.mxu1 %v3187_v37 }
  0x22   :  { %1022 = vmatpush1.bf16.msra.mxu0 %v3152_v35  ;;  %2969 = vmatpush3.bf16.msra.mxu1 %v3188_v38 }
  0x23   :  { %1023 = vmatprep.subr.bf16.mxu0 %v3157_v36  ;;  %2970 = vmatprep.subr.bf16.mxu1 %v3192_v41 }
  0x26   :  { %1024 = vmatpush1.bf16.msra.mxu0 %v3155_v39  ;;  %2971 = vmatpush3.bf16.msra.mxu1 %v3193_v57 }
  0x27   :  { %1025 = vmatprep.subr.bf16.mxu0 %v3160_v40  ;;  %2972 = vmatprep.subr.bf16.mxu1 %v3197_v59 }
  0x2a   :  { %1026 = vmatpush1.bf16.msra.mxu0 %v3158_v42  ;;  %2973 = vmatpush3.bf16.msra.mxu1 %v3198_v61 }
  0x2b   :  { %1027 = vmatprep.subr.bf16.mxu0 %v3163_v43  ;;  %2974 = vmatprep.subr.bf16.mxu1 %v3202_v63 }
  0x2e   :  { %1028 = vmatpush1.bf16.msra.mxu0 %v3161_v44  ;;  %2975 = vmatpush3.bf16.msra.mxu1 %v3203_v1  ;;  %v3209_v1 = vld [vmem:[%s4303_s3 + $0x198] ss:$12 sps:$4 sm:$0xff]  }
  0x2f   :  { %1029 = vmatprep.subr.bf16.mxu0 %v3166_v45  ;;  %2982 = vmatprep.subr.bf16.mxu1 %v3207_v3  ;;  %v3204_v45 = vld [vmem:[%s4303_s3 + $0x180] ss:$12 sps:$4 sm:$0xff]  }
  0x32   :  { %1030 = vmatpush1.bf16.msra.mxu0 %v3164_v46 }
  0x33   :  { %1031 = vmatprep.subr.bf16.mxu0 %v3171_v47 }
  0x36   :  { %1032 = vmatpush1.bf16.msra.mxu0 %v3169_v48 }
  0x37   :  { %1033 = vmatprep.subr.bf16.mxu0 %v3176_v49 }
  0x3a   :  { %1034 = vmatpush1.bf16.msra.mxu0 %v3174_v50  ;;  %v3208_v50 = vld [vmem:[%s4303_s3 + $0x188] ss:$12 sps:$4 sm:$0xff]  }
  0x3b   :  { %1035 = vmatprep.subr.bf16.mxu0 %v3181_v51  ;;  %v3211_v51 = vld [vmem:[%s4303_s3 + $0x19c] ss:$12 sps:$4 sm:$0xff]  }
  0x3e   :  { %1036 = vmatpush1.bf16.msra.mxu0 %v3179_v52 }
  0x3f   :  { %1037 = vmatprep.subr.bf16.mxu0 %v3186_v53 }
  0x42   :  { %1038 = vmatpush1.bf16.msra.mxu0 %v3184_v54 }
  0x43   :  { %1039 = vmatprep.subr.bf16.mxu0 %v3191_v55 }
  0x46   :  { %1040 = vmatpush1.bf16.msra.mxu0 %v3189_v56  ;;  %v3212_v56 = vld [vmem:[%s4303_s3 + $0x260] ss:$12 sps:$4 sm:$0xff]  }
  0x47   :  { %1041 = vmatprep.subr.bf16.mxu0 %v3196_v58 }
  0x4a   :  { %1042 = vmatpush1.bf16.msra.mxu0 %v3194_v60 }
  0x4b   :  { %1043 = vmatprep.subr.bf16.mxu0 %v3201_v62 }
  0x4e   :  { %1044 = vmatpush1.bf16.msra.mxu0 %v3199_v0 }
  0x4f   :  { %1056 = vmatprep.subr.bf16.mxu0 %v3206_v2  ;;  %v3213_v2 = vld [vmem:[%s4303_s3 + $0x1a0] ss:$12 sps:$4 sm:$0xff]  }
  0xdc   :  { %v162_v18 = vpop.f32.mrb[0].mxu0  ;;  %v205_v25 = vpop.f32.mrb[0].mxu1 }
  0xdd   :  { %v163_v20 = vadd.f32 %v162_v18, %v42_v11  ;;  %v164_v21 = vpop.f32.mrb[1].mxu0  ;;  %v206_v32 = vadd.f32 %v205_v25, %v50_v17  ;;  %v207_v33 = vpop.f32.mrb[1].mxu1 }
  0xde   :  { %v165_v23 = vadd.f32 %v164_v21, %v46_v13  ;;  %v166_v24 = vpop.f32.mrb[2].mxu0  ;;  %v208_v36 = vadd.f32 %v207_v33, %v54_v19  ;;  %v209_v37 = vpop.f32.mrb[2].mxu1 }
  0xdf   :  { %vm300_vm1 = vcmp.gt.f32.partialorder %v163_v20, 0.0  ;;  %v316_v29 = vmul.f32 0.01, %v163_v20  ;;  %v167_v30 = vadd.f32 %v166_v24, %v42_v11  ;;  %v168_v31 = vpop.f32.mrb[3].mxu0  ;;  %vm302_vm4 = vcmp.gt.f32.partialorder %v206_v32, 0.0  ;;  %v211_v40 = vpop.f32.mrb[3].mxu1 }
  0xe0   :  { %vm301_vm2 = vcmp.gt.f32.partialorder %v165_v23, 0.0  ;;  %v317_v34 = vmul.f32 0.01, %v165_v23  ;;  %v169_v35 = vadd.f32 %v168_v31, %v46_v13  ;;  %v318_v43 = vmul.f32 0.01, %v206_v32 }
  0xe1   :  { %v332_v38 = vsel %vm300_vm1, %v163_v20, %v316_v29  ;;  %vm308_vm3 = vcmp.gt.f32.partialorder %v167_v30, 0.0  ;;  %v324_v39 = vmul.f32 0.01, %v167_v30  ;;  %vm303_vm6 = vcmp.gt.f32.partialorder %v208_v36, 0.0  ;;  %v3216_v11 = vld [vmem:[%s4303_s3 + $0x1b4] ss:$12 sps:$4 sm:$0xff]  }
  0xe2   :  { %vm309_vm5 = vcmp.gt.f32.partialorder %v169_v35, 0.0  ;;  %v325_v41 = vmul.f32 0.01, %v169_v35  ;;  %v333_v42 = vsel %vm301_vm2, %v165_v23, %v317_v34  ;;  %v319_v46 = vmul.f32 0.01, %v208_v36 }
  0xe3   :  { %v340_v44 = vsel %vm308_vm3, %v167_v30, %v324_v39  ;;  %v210_v47 = vadd.f32 %v209_v37, %v50_v17  ;;  %v334_v52 = vsel %vm302_vm4, %v206_v32, %v318_v43  ;;  %v212_v53 = vadd.f32 %v211_v40, %v54_v19  ;;  %v3217_v19 = vld [vmem:[%s4303_s3 + $0x278] ss:$12 sps:$4 sm:$0xff]   ;;  %v3214_v23 = vld [vmem:[%s4303_s3 + $0x1b0] ss:$12 sps:$4 sm:$0xff]   ;;  %v3219_v43 = vld [vmem:[%s4303_s3 + $0x1c8] ss:$12 sps:$4 sm:$0xff]  }
  0xe4   :  { %v348_v48 = vpack.c.bf16 %v340_v44, %v332_v38  ;;  %v341_v49 = vsel %vm309_vm5, %v169_v35, %v325_v41  ;;  %v248_v54 = vpop.f32.mrb[4].mxu0  ;;  %v335_v58 = vsel %vm303_vm6, %v208_v36, %v319_v46  ;;  %v291_v0 = vpop.f32.mrb[4].mxu1  ;;  %v3218_v31 = vld [vmem:[%s4303_s3 + $0x1b8] ss:$12 sps:$4 sm:$0xff]   ;;  %v3222_v37 = vld [vmem:[%s4303_s3 + $0x290] ss:$12 sps:$4 sm:$0xff]  }
  0xe5   :  { %v349_v55 = vpack.c.bf16 %v341_v49, %v333_v42  ;;  %vm310_vm7 = vcmp.gt.f32.partialorder %v210_v47, 0.0  ;;  %v326_v57 = vmul.f32 0.01, %v210_v47  ;;  %v250_v59 = vpop.f32.mrb[5].mxu0  ;;  %vm311_vm8 = vcmp.gt.f32.partialorder %v212_v53, 0.0  ;;  %v293_v10 = vpop.f32.mrb[5].mxu1 }
  0xe6   :  { %v327_v60 = vmul.f32 0.01, %v212_v53  ;;  %v249_v61 = vadd.f32 %v248_v54, %v58_v22  ;;  %v251_v62 = vadd.f32 %v250_v59, %v3670_v26  ;;  %v252_v63 = vpop.f32.mrb[6].mxu0  ;;  %v292_v7 = vadd.f32 %v291_v0, %v3672_v27  ;;  %v295_v15 = vpop.f32.mrb[6].mxu1  ;;  %v3221_v34 = vld [vmem:[%s4303_s3 + $0x1cc] ss:$12 sps:$4 sm:$0xff]  }
  0xe7   :  { %1045 = vmatprep.mubr.bf16.mxu0 %v349_v55  ;;  %1131 = vmatprep.mubr.bf16.mxu1 %v349_v55  ;;  %v342_v3 = vsel %vm310_vm7, %v210_v47, %v326_v57  ;;  %v253_v4 = vadd.f32 %v252_v63, %v58_v22  ;;  %v254_v5 = vpop.f32.mrb[7].mxu0  ;;  %v297_v18 = vpop.f32.mrb[7].mxu1  ;;  %v294_v29 = vadd.f32 %v293_v10, %v3674_v28  ;;  %v3223_v44 = vld [vmem:[%s4303_s3 + $0x1d0] ss:$12 sps:$4 sm:$0xff]   ;;  %v3229_v54 = vld [vmem:[%s4303_s3 + $0x1f8] ss:$12 sps:$4 sm:$0xff]  }
  0xe8   :  { %1046 = vmatmul.mubr.bf16.vlgmr.msra.gmra.mrb[8].mxu0 %v348_v48  ;;  %1132 = vmatmul.mubr.bf16.vlgmr.msra.gmra.mrb[8].mxu1 %v348_v48  ;;  %v3699_v12 = vpack.c.bf16 %v342_v3, %v334_v52  ;;  %v343_v13 = vsel %vm311_vm8, %v212_v53, %v327_v60  ;;  %vm304_vm9 = vcmp.gt.f32.partialorder %v249_v61, 0.0  ;;  %v320_v14 = vmul.f32 0.01, %v249_v61  ;;  %v3226_v47 = vld [vmem:[%s4303_s3 + $0x1e4] ss:$12 sps:$4 sm:$0xff]  }
  0xe9   :  { %1057 = vmatpush1.bf16.msra.mxu0 %v3204_v45  ;;  %2983 = vmatpush3.bf16.msra.mxu1 %v3208_v50  ;;  %v351_v16 = vpack.c.bf16 %v343_v13, %v335_v58  ;;  %vm305_vm10 = vcmp.gt.f32.partialorder %v251_v62, 0.0  ;;  %v321_v17 = vmul.f32 0.01, %v251_v62  ;;  %vm312_vm11 = vcmp.gt.f32.partialorder %v253_v4, 0.0  ;;  %v3227_v48 = vld [vmem:[%s4303_s3 + $0x2a8] ss:$12 sps:$4 sm:$0xff]  }
  0xea   :  { %1058 = vmatprep.subr.bf16.mxu0 %v3211_v51  ;;  %2984 = vmatprep.subr.bf16.mxu1 %v3212_v56  ;;  %v336_v20 = vsel %vm304_vm9, %v249_v61, %v320_v14  ;;  %v328_v21 = vmul.f32 0.01, %v253_v4  ;;  %v255_v22 = vadd.f32 %v254_v5, %v3670_v26  ;;  %vm306_vm12 = vcmp.gt.f32.partialorder %v292_v7, 0.0  ;;  %v3224_v50 = vld [vmem:[%s4303_s3 + $0x1e0] ss:$12 sps:$4 sm:$0xff]  }
  0xeb   :  { %1088 = vmatprep.mubr.bf16.mxu0 %v351_v16  ;;  %1172 = vmatprep.mubr.bf16.mxu1 %v351_v16  ;;  %v337_v24 = vsel %vm305_vm10, %v251_v62, %v321_v17  ;;  %v322_v25 = vmul.f32 0.01, %v292_v7  ;;  %v296_v30 = vadd.f32 %v295_v15, %v3672_v27  ;;  %v298_v33 = vadd.f32 %v297_v18, %v3674_v28  ;;  %v3228_v51 = vld [vmem:[%s4303_s3 + $0x1e8] ss:$12 sps:$4 sm:$0xff]   ;;  %v3232_v53 = vld [vmem:[%s4303_s3 + $0x2c0] ss:$12 sps:$4 sm:$0xff]  }
  0xec   :  { %v344_v32 = vsel %vm312_vm11, %v253_v4, %v328_v21  ;;  %vm313_vm13 = vcmp.gt.f32.partialorder %v255_v22, 0.0  ;;  %v329_v26 = vmul.f32 0.01, %v255_v22  ;;  %vm307_vm14 = vcmp.gt.f32.partialorder %v294_v29, 0.0  ;;  %v3231_v52 = vld [vmem:[%s4303_s3 + $0x1fc] ss:$12 sps:$4 sm:$0xff]  }
  0xed   :  { %1059 = vmatpush1.bf16.msra.mxu0 %v3209_v1  ;;  %2985 = vmatpush3.bf16.msra.mxu1 %v3213_v2  ;;  %v3719_v35 = vpack.c.bf16 %v344_v32, %v336_v20  ;;  %v338_v27 = vsel %vm306_vm12, %v292_v7, %v322_v25  ;;  %v323_v36 = vmul.f32 0.01, %v294_v29  ;;  %vm314_vm15 = vcmp.gt.f32.partialorder %v296_v30, 0.0  ;;  %v3233_v55 = vld [vmem:[%s4303_s3 + $0x200] ss:$12 sps:$4 sm:$0xff]  }
  0xee   :  { %1060 = vmatprep.subr.bf16.mxu0 %v3216_v11  ;;  %2986 = vmatprep.subr.bf16.mxu1 %v3217_v19  ;;  %v345_v38 = vsel %vm313_vm13, %v255_v22, %v329_v26  ;;  %v330_v28 = vmul.f32 0.01, %v296_v30  ;;  %vm315_vm0 = vcmp.gt.f32.partialorder %v298_v33, 0.0  ;;  %v331_v40 = vmul.f32 0.01, %v298_v33 }
  0xef   :  { %v3725_v39 = vpack.c.bf16 %v345_v38, %v337_v24  ;;  %v339_v41 = vsel %vm307_vm14, %v294_v29, %v323_v36  ;;  %v3236_v56 = vld [vmem:[%s4303_s3 + $0x214] ss:$12 sps:$4 sm:$0xff]   ;;  %v3237_v57 = vld [vmem:[%s4303_s3 + $0x2d8] ss:$12 sps:$4 sm:$0xff]   ;;  %v3234_v58 = vld [vmem:[%s4303_s3 + $0x210] ss:$12 sps:$4 sm:$0xff]  }
  0xf0   :  { %v346_v42 = vsel %vm314_vm15, %v296_v30, %v330_v28  ;;  %v347_v46 = vsel %vm315_vm0, %v298_v33, %v331_v40  ;;  %v3238_v59 = vld [vmem:[%s4303_s3 + $0x218] ss:$12 sps:$4 sm:$0xff]   ;;  %v3242_v61 = vld [vmem:[%s4303_s3 + $0x2f0] ss:$12 sps:$4 sm:$0xff]   ;;  %v3239_v62 = vld [vmem:[%s4303_s3 + $0x228] ss:$12 sps:$4 sm:$0xff]  }
  0xf1   :  { %1061 = vmatpush1.bf16.msra.mxu0 %v3214_v23  ;;  %2987 = vmatpush3.bf16.msra.mxu1 %v3218_v31  ;;  %v3733_v45 = vpack.c.bf16 %v346_v42, %v338_v27  ;;  %v3741_v49 = vpack.c.bf16 %v347_v46, %v339_v41  ;;  %v3241_v60 = vld [vmem:[%s4303_s3 + $0x22c] ss:$12 sps:$4 sm:$0xff]   ;;  %v3243_v63 = vld [vmem:[%s4303_s3 + $0x230] ss:$12 sps:$4 sm:$0xff]   ;;  %v3258_v11 = vld [vmem:[%s4303_s3 + $0x274] ss:$12 sps:$4 sm:$0xff]  }
  0xf2   :  { %1062 = vmatprep.subr.bf16.mxu0 %v3221_v34  ;;  %2988 = vmatprep.subr.bf16.mxu1 %v3222_v37  ;;  %v3246_v0 = vld [vmem:[%s4303_s3 + $0x244] ss:$12 sps:$4 sm:$0xff]   ;;  %v3244_v2 = vld [vmem:[%s4303_s3 + $0x240] ss:$12 sps:$4 sm:$0xff]   ;;  %v3252_v4 = vld [vmem:[%s4303_s3 + $0x25c] ss:$12 sps:$4 sm:$0xff]  }
  0xf3   :  { %v3249_v1 = vld [vmem:[%s4303_s3 + $0x304] ss:$12 sps:$4 sm:$0xff]   ;;  %v3247_v3 = vld [vmem:[%s4303_s3 + $0x300] ss:$12 sps:$4 sm:$0xff]   ;;  %v3255_v5 = vld [vmem:[%s4303_s3 + $0x31c] ss:$12 sps:$4 sm:$0xff]  }
  0xf4   :  { %v3250_v7 = vld [vmem:[%s4303_s3 + $0x258] ss:$12 sps:$4 sm:$0xff]   ;;  %v3261_v13 = vld [vmem:[%s4303_s3 + $0x334] ss:$12 sps:$4 sm:$0xff]   ;;  %v3256_v14 = vld [vmem:[%s4303_s3 + $0x270] ss:$12 sps:$4 sm:$0xff]  }
  0xf5   :  { %1063 = vmatpush1.bf16.msra.mxu0 %v3219_v43  ;;  %2989 = vmatpush3.bf16.msra.mxu1 %v3223_v44  ;;  %v3253_v10 = vld [vmem:[%s4303_s3 + $0x318] ss:$12 sps:$4 sm:$0xff]   ;;  %v3259_v15 = vld [vmem:[%s4303_s3 + $0x330] ss:$12 sps:$4 sm:$0xff]   ;;  %v3262_v18 = vld [vmem:[%s4303_s3 + $0x288] ss:$12 sps:$4 sm:$0xff]  }
  0xf6   :  { %1064 = vmatprep.subr.bf16.mxu0 %v3226_v47  ;;  %2990 = vmatprep.subr.bf16.mxu1 %v3227_v48  ;;  %v3264_v16 = vld [vmem:[%s4303_s3 + $0x28c] ss:$12 sps:$4 sm:$0xff]   ;;  %v3265_v19 = vld [vmem:[%s4303_s3 + $0x348] ss:$12 sps:$4 sm:$0xff]   ;;  %v3270_v20 = vld [vmem:[%s4303_s3 + $0x2a4] ss:$12 sps:$4 sm:$0xff]  }
  0xf7   :  { %v3267_v17 = vld [vmem:[%s4303_s3 + $0x34c] ss:$12 sps:$4 sm:$0xff]   ;;  %v3273_v21 = vld [vmem:[%s4303_s3 + $0x364] ss:$12 sps:$4 sm:$0xff]   ;;  %v3276_v24 = vld [vmem:[%s4303_s3 + $0x2bc] ss:$12 sps:$4 sm:$0xff]  }
  0xf8   :  { %v3268_v22 = vld [vmem:[%s4303_s3 + $0x2a0] ss:$12 sps:$4 sm:$0xff]   ;;  %v3279_v25 = vld [vmem:[%s4303_s3 + $0x37c] ss:$12 sps:$4 sm:$0xff]   ;;  %v3274_v29 = vld [vmem:[%s4303_s3 + $0x2b8] ss:$12 sps:$4 sm:$0xff]  }
  0xf9   :  { %1065 = vmatpush1.bf16.msra.mxu0 %v3224_v50  ;;  %2991 = vmatpush3.bf16.msra.mxu1 %v3228_v51  ;;  %v3271_v23 = vld [vmem:[%s4303_s3 + $0x360] ss:$12 sps:$4 sm:$0xff]   ;;  %v3277_v30 = vld [vmem:[%s4303_s3 + $0x378] ss:$12 sps:$4 sm:$0xff]   ;;  %v3280_v26 = vld [vmem:[%s4303_s3 + $0x2d0] ss:$12 sps:$4 sm:$0xff]  }
  0xfa   :  { %1066 = vmatprep.subr.bf16.mxu0 %v3231_v52  ;;  %2992 = vmatprep.subr.bf16.mxu1 %v3232_v53  ;;  %v3282_v31 = vld [vmem:[%s4303_s3 + $0x2d4] ss:$12 sps:$4 sm:$0xff]   ;;  %v3283_v33 = vld [vmem:[%s4303_s3 + $0x390] ss:$12 sps:$4 sm:$0xff]   ;;  %v3288_v34 = vld [vmem:[%s4303_s3 + $0x2ec] ss:$12 sps:$4 sm:$0xff]  }
  0xfb   :  { %v3285_v32 = vld [vmem:[%s4303_s3 + $0x394] ss:$12 sps:$4 sm:$0xff]   ;;  %v3291_v27 = vld [vmem:[%s4303_s3 + $0x3ac] ss:$12 sps:$4 sm:$0xff]   ;;  %v3294_v38 = vld [vmem:[%s4303_s3 + $0x3c4] ss:$12 sps:$4 sm:$0xff]  }
  0xfc   :  { %v3286_v36 = vld [vmem:[%s4303_s3 + $0x2e8] ss:$12 sps:$4 sm:$0xff]   ;;  %v3292_v40 = vld [vmem:[%s4303_s3 + $0x3c0] ss:$12 sps:$4 sm:$0xff]   ;;  %v3297_v44 = vld [vmem:[%s4303_s3 + $0x3d8] ss:$12 sps:$4 sm:$0xff]  }
  0xfd   :  { %1067 = vmatpush1.bf16.msra.mxu0 %v3229_v54  ;;  %2993 = vmatpush3.bf16.msra.mxu1 %v3233_v55  ;;  %v3289_v37 = vld [vmem:[%s4303_s3 + $0x3a8] ss:$12 sps:$4 sm:$0xff]   ;;  %v3300_v43 = vld [vmem:[%s4303_s3 + $0x3e0] ss:$12 sps:$4 sm:$0xff]   ;;  %v3302_v48 = vld [vmem:[%s4303_s3 + $0x3f0] ss:$12 sps:$4 sm:$0xff]  }
  0xfe   :  { %1068 = vmatprep.subr.bf16.mxu0 %v3236_v56  ;;  %2994 = vmatprep.subr.bf16.mxu1 %v3237_v57  ;;  %v3295_v28 = vld [vmem:[%s4303_s3 + $0x3c8] ss:$12 sps:$4 sm:$0xff]   ;;  %v3301_v46 = vld [vmem:[%s4303_s3 + $0x320] ss:$12 sps:$4 sm:$0xff]   ;;  %v3306_v50 = vld [vmem:[%s4303_s3 + $0x338] ss:$12 sps:$4 sm:$0xff]  }
  0xff   :  { %v3296_v41 = vld [vmem:[%s4303_s3 + $0x308] ss:$12 sps:$4 sm:$0xff]   ;;  %v3309_v51 = vld [vmem:[%s4303_s3 + $0x40c] ss:$12 sps:$4 sm:$0xff]   ;;  %v3311_v53 = vld [vmem:[%s4303_s3 + $0x350] ss:$12 sps:$4 sm:$0xff]  }
 0x100   :  { %v3299_v42 = vld [vmem:[%s4303_s3 + $0x3dc] ss:$12 sps:$4 sm:$0xff]   ;;  %v3304_v47 = vld [vmem:[%s4303_s3 + $0x3f4] ss:$12 sps:$4 sm:$0xff]   ;;  %v3314_v54 = vld [vmem:[%s4303_s3 + $0x424] ss:$12 sps:$4 sm:$0xff]  }
 0x101   :  { %1069 = vmatpush1.bf16.msra.mxu0 %v3234_v58  ;;  %2995 = vmatpush3.bf16.msra.mxu1 %v3238_v59  ;;  %v3307_v52 = vld [vmem:[%s4303_s3 + $0x408] ss:$12 sps:$4 sm:$0xff]   ;;  %v3312_v56 = vld [vmem:[%s4303_s3 + $0x420] ss:$12 sps:$4 sm:$0xff]   ;;  %vm2244_vm1 = vcmask 1045504   ;;  %vm3436_vm2 = vmmov 0  }
 0x102   :  { %1070 = vmatprep.subr.bf16.mxu0 %v3241_v60  ;;  %2996 = vmatprep.subr.bf16.mxu1 %v3242_v61  ;;  %v3315_v55 = vld [vmem:[%s4303_s3 + $0x428] ss:$12 sps:$4 sm:$0xff]   ;;  %v3320_v59 = vld [vmem:[%s4303_s3 + $0x440] ss:$12 sps:$4 sm:$0xff]   ;;  %v3317_v60 = vld [vmem:[%s4303_s3 + $0x438] ss:$12 sps:$4 sm:$0xff]  }
 0x103   :  { %v3316_v57 = vld [vmem:[%s4303_s3 + $0x368] ss:$12 sps:$4 sm:$0xff]   ;;  %v3321_v61 = vld [vmem:[%s4303_s3 + $0x380] ss:$12 sps:$4 sm:$0xff]   ;;  %vm2240_vm11 = vcmask 359424   ;;  %vm2540_vm0 = vcmask 15360  }
 0x104   :  { %v3319_v58 = vld [vmem:[%s4303_s3 + $0x43c] ss:$12 sps:$4 sm:$0xff]  }
 0x105   :  { %1071 = vmatpush1.bf16.msra.mxu0 %v3239_v62  ;;  %2997 = vmatpush3.bf16.msra.mxu1 %v3243_v63  ;;  %v3324_v62 = vld [vmem:[%s4303_s3 + $0x454] ss:$12 sps:$4 sm:$0xff]   ;;  %v3325_v63 = vld [vmem:[%s4303_s3 + $0x458] ss:$12 sps:$4 sm:$0xff]  }
 0x106   :  { %1072 = vmatprep.subr.bf16.mxu0 %v3246_v0  ;;  %1861 = vmatprep.subr.bf16.mxu1 %v3249_v1  ;;  %v3322_v0 = vld [vmem:[%s4303_s3 + $0x450] ss:$12 sps:$4 sm:$0xff]   ;;  %v3326_v1 = vld [vmem:[%s4303_s3 + $0x398] ss:$12 sps:$4 sm:$0xff]  }
 0x108   :  { %1173 = vmatmul.mubr.bf16.vlgmr.msra.gmra.mrb[12].mxu1 %v3699_v12 }
 0x109   :  { %1073 = vmatpush1.bf16.msra.mxu0 %v3244_v2  ;;  %1862 = vmatpush1.bf16.msra.mxu1 %v3247_v3  ;;  %v3329_v2 = vld [vmem:[%s4303_s3 + $0x46c] ss:$12 sps:$4 sm:$0xff]   ;;  %v3330_v3 = vld [vmem:[%s4303_s3 + $0x470] ss:$12 sps:$4 sm:$0xff]  }
 0x10a   :  { %1074 = vmatprep.subr.bf16.mxu0 %v3252_v4  ;;  %1863 = vmatprep.subr.bf16.mxu1 %v3255_v5  ;;  %v3327_v4 = vld [vmem:[%s4303_s3 + $0x468] ss:$12 sps:$4 sm:$0xff]   ;;  %v3331_v5 = vld [vmem:[%s4303_s3 + $0x3b0] ss:$12 sps:$4 sm:$0xff]  }
 0x10b   :  { %1893 = vmatprep.mubr.bf16.mxu1 %v3725_v39 }
 0x10d   :  { %1075 = vmatpush1.bf16.msra.mxu0 %v3250_v7  ;;  %1864 = vmatpush1.bf16.msra.mxu1 %v3253_v10  ;;  %v3334_v7 = vld [vmem:[%s4303_s3 + $0x484] ss:$12 sps:$4 sm:$0xff]   ;;  %v3335_v10 = vld [vmem:[%s4303_s3 + $0x548] ss:$12 sps:$4 sm:$0xff]  }
 0x10e   :  { %1076 = vmatprep.subr.bf16.mxu0 %v3258_v11  ;;  %1865 = vmatprep.subr.bf16.mxu1 %v3261_v13  ;;  %v3332_v11 = vld [vmem:[%s4303_s3 + $0x480] ss:$12 sps:$4 sm:$0xff]   ;;  %v3336_v13 = vld [vmem:[%s4303_s3 + $0x488] ss:$12 sps:$4 sm:$0xff]  }
 0x111   :  { %1077 = vmatpush1.bf16.msra.mxu0 %v3256_v14  ;;  %1866 = vmatpush1.bf16.msra.mxu1 %v3259_v15  ;;  %v3339_v14 = vld [vmem:[%s4303_s3 + $0x49c] ss:$12 sps:$4 sm:$0xff]   ;;  %v3340_v15 = vld [vmem:[%s4303_s3 + $0x560] ss:$12 sps:$4 sm:$0xff]  }
 0x112   :  { %1078 = vmatprep.subr.bf16.mxu0 %v3264_v16  ;;  %1867 = vmatprep.subr.bf16.mxu1 %v3267_v17  ;;  %v3337_v16 = vld [vmem:[%s4303_s3 + $0x498] ss:$12 sps:$4 sm:$0xff]   ;;  %v3341_v17 = vld [vmem:[%s4303_s3 + $0x4a0] ss:$12 sps:$4 sm:$0xff]  }
 0x115   :  { %1079 = vmatpush1.bf16.msra.mxu0 %v3262_v18  ;;  %1868 = vmatpush1.bf16.msra.mxu1 %v3265_v19  ;;  %v3344_v18 = vld [vmem:[%s4303_s3 + $0x4b4] ss:$12 sps:$4 sm:$0xff]   ;;  %v3342_v19 = vld [vmem:[%s4303_s3 + $0x4b0] ss:$12 sps:$4 sm:$0xff]  }
 0x116   :  { %1080 = vmatprep.subr.bf16.mxu0 %v3270_v20  ;;  %1869 = vmatprep.subr.bf16.mxu1 %v3273_v21  ;;  %v3346_v20 = vld [vmem:[%s4303_s3 + $0x4b8] ss:$12 sps:$4 sm:$0xff]  }
 0x117   :  { %v3349_v21 = vld [vmem:[%s4303_s3 + $0x4cc] ss:$12 sps:$4 sm:$0xff]  }
 0x119   :  { %1081 = vmatpush1.bf16.msra.mxu0 %v3268_v22  ;;  %1870 = vmatpush1.bf16.msra.mxu1 %v3271_v23  ;;  %v3347_v22 = vld [vmem:[%s4303_s3 + $0x4c8] ss:$12 sps:$4 sm:$0xff]   ;;  %v3351_v23 = vld [vmem:[%s4303_s3 + $0x4d0] ss:$12 sps:$4 sm:$0xff]  }
 0x11a   :  { %1082 = vmatprep.subr.bf16.mxu0 %v3276_v24  ;;  %1871 = vmatprep.subr.bf16.mxu1 %v3279_v25  ;;  %v3354_v24 = vld [vmem:[%s4303_s3 + $0x4e4] ss:$12 sps:$4 sm:$0xff]   ;;  %v3355_v25 = vld [vmem:[%s4303_s3 + $0x5a8] ss:$12 sps:$4 sm:$0xff]  }
 0x11d   :  { %1083 = vmatpush1.bf16.msra.mxu0 %v3274_v29  ;;  %1872 = vmatpush1.bf16.msra.mxu1 %v3277_v30  ;;  %v3352_v29 = vld [vmem:[%s4303_s3 + $0x4e0] ss:$12 sps:$4 sm:$0xff]   ;;  %v3356_v30 = vld [vmem:[%s4303_s3 + $0x4e8] ss:$12 sps:$4 sm:$0xff]  }
 0x11e   :  { %1084 = vmatprep.subr.bf16.mxu0 %v3282_v31  ;;  %1873 = vmatprep.subr.bf16.mxu1 %v3285_v32  ;;  %v3359_v31 = vld [vmem:[%s4303_s3 + $0x4fc] ss:$12 sps:$4 sm:$0xff]   ;;  %v3360_v32 = vld [vmem:[%s4303_s3 + $0x5c0] ss:$12 sps:$4 sm:$0xff]  }
 0x121   :  { %1085 = vmatpush1.bf16.msra.mxu0 %v3280_v26  ;;  %1874 = vmatpush1.bf16.msra.mxu1 %v3283_v33  ;;  %v3357_v26 = vld [vmem:[%s4303_s3 + $0x4f8] ss:$12 sps:$4 sm:$0xff]   ;;  %v3361_v33 = vld [vmem:[%s4303_s3 + $0x500] ss:$12 sps:$4 sm:$0xff]  }
 0x122   :  { %1086 = vmatprep.subr.bf16.mxu0 %v3288_v34  ;;  %1875 = vmatprep.subr.bf16.mxu1 %v3291_v27  ;;  %v3364_v34 = vld [vmem:[%s4303_s3 + $0x514] ss:$12 sps:$4 sm:$0xff]   ;;  %v3365_v27 = vld [vmem:[%s4303_s3 + $0x5d8] ss:$12 sps:$4 sm:$0xff]  }
 0x125   :  { %1087 = vmatpush1.bf16.msra.mxu0 %v3286_v36  ;;  %1876 = vmatpush1.bf16.msra.mxu1 %v3289_v37  ;;  %v3362_v36 = vld [vmem:[%s4303_s3 + $0x510] ss:$12 sps:$4 sm:$0xff]   ;;  %v3366_v37 = vld [vmem:[%s4303_s3 + $0x518] ss:$12 sps:$4 sm:$0xff]  }
 0x126   :  { %1877 = vmatprep.subr.bf16.mxu1 %v3294_v38  ;;  %3004 = vmatprep.subr.bf16.mxu0 %v3295_v28  ;;  %v3369_v38 = vld [vmem:[%s4303_s3 + $0x52c] ss:$12 sps:$4 sm:$0xff]   ;;  %v3370_v28 = vld [vmem:[%s4303_s3 + $0x5f0] ss:$12 sps:$4 sm:$0xff]  }
 0x128   :  { %1089 = vmatmul.mubr.bf16.vlgmr.msra.gmra.mrb[8].mxu0 %v3699_v12  ;;  %v3305_v12 = vld [vmem:[%s4303_s3 + $0x3f8] ss:$12 sps:$4 sm:$0xff]  }
 0x129   :  { %1878 = vmatpush1.bf16.msra.mxu1 %v3292_v40  ;;  %3005 = vmatpush3.bf16.msra.mxu0 %v3296_v41  ;;  %v3367_v40 = vld [vmem:[%s4303_s3 + $0x528] ss:$12 sps:$4 sm:$0xff]   ;;  %v3371_v41 = vld [vmem:[%s4303_s3 + $0x530] ss:$12 sps:$4 sm:$0xff]  }
 0x12a   :  { %1879 = vmatprep.subr.bf16.mxu1 %v3299_v42  ;;  %3006 = vmatprep.subr.bf16.mxu0 %v3300_v43  ;;  %v3374_v42 = vld [vmem:[%s4303_s3 + $0x544] ss:$12 sps:$4 sm:$0xff]   ;;  %v3372_v43 = vld [vmem:[%s4303_s3 + $0x540] ss:$12 sps:$4 sm:$0xff]  }
 0x12b   :  { %1979 = vmatprep.mubr.bf16.mxu0 %v3725_v39  ;;  %v3310_v39 = vld [vmem:[%s4303_s3 + $0x410] ss:$12 sps:$4 sm:$0xff]  }
 0x12d   :  { %1880 = vmatpush1.bf16.msra.mxu1 %v3297_v44  ;;  %3007 = vmatpush3.bf16.msra.mxu0 %v3301_v46  ;;  %v3377_v44 = vld [vmem:[%s4303_s3 + $0x55c] ss:$12 sps:$4 sm:$0xff]   ;;  %v3375_v46 = vld [vmem:[%s4303_s3 + $0x558] ss:$12 sps:$4 sm:$0xff]  }
 0x12e   :  { %1881 = vmatprep.subr.bf16.mxu1 %v3304_v47  ;;  %3008 = vmatprep.subr.bf16.mxu0 %v3305_v12  ;;  %v3380_v47 = vld [vmem:[%s4303_s3 + $0x574] ss:$12 sps:$4 sm:$0xff]   ;;  %v3378_v12 = vld [vmem:[%s4303_s3 + $0x570] ss:$12 sps:$4 sm:$0xff]  }
 0x131   :  { %1882 = vmatpush1.bf16.msra.mxu1 %v3302_v48  ;;  %3009 = vmatpush3.bf16.msra.mxu0 %v3306_v50  ;;  %v3383_v48 = vld [vmem:[%s4303_s3 + $0x58c] ss:$12 sps:$4 sm:$0xff]   ;;  %v3381_v50 = vld [vmem:[%s4303_s3 + $0x588] ss:$12 sps:$4 sm:$0xff]  }
 0x132   :  { %1883 = vmatprep.subr.bf16.mxu1 %v3309_v51  ;;  %3010 = vmatprep.subr.bf16.mxu0 %v3310_v39  ;;  %v3386_v51 = vld [vmem:[%s4303_s3 + $0x5a4] ss:$12 sps:$4 sm:$0xff]   ;;  %v3384_v39 = vld [vmem:[%s4303_s3 + $0x5a0] ss:$12 sps:$4 sm:$0xff]  }
 0x135   :  { %1884 = vmatpush1.bf16.msra.mxu1 %v3307_v52  ;;  %3011 = vmatpush3.bf16.msra.mxu0 %v3311_v53  ;;  %v3389_v52 = vld [vmem:[%s4303_s3 + $0x5bc] ss:$12 sps:$4 sm:$0xff]   ;;  %v3387_v53 = vld [vmem:[%s4303_s3 + $0x5b8] ss:$12 sps:$4 sm:$0xff]  }
 0x136   :  { %1885 = vmatprep.subr.bf16.mxu1 %v3314_v54  ;;  %3012 = vmatprep.subr.bf16.mxu0 %v3315_v55  ;;  %v3392_v54 = vld [vmem:[%s4303_s3 + $0x5d4] ss:$12 sps:$4 sm:$0xff]   ;;  %v3390_v55 = vld [vmem:[%s4303_s3 + $0x5d0] ss:$12 sps:$4 sm:$0xff]  }
 0x139   :  { %1886 = vmatpush1.bf16.msra.mxu1 %v3312_v56  ;;  %3013 = vmatpush3.bf16.msra.mxu0 %v3316_v57  ;;  %v3395_v56 = vld [vmem:[%s4303_s3 + $0x5ec] ss:$12 sps:$4 sm:$0xff]   ;;  %v3393_v57 = vld [vmem:[%s4303_s3 + $0x5e8] ss:$12 sps:$4 sm:$0xff]  }
 0x13a   :  { %1887 = vmatprep.subr.bf16.mxu1 %v3319_v58  ;;  %3014 = vmatprep.subr.bf16.mxu0 %v3320_v59  ;;  %v3396_v58 = vld [vmem:[%s4305_s5 + $0x118] sm:$0xff]  }
 0x13d   :  { %1888 = vmatpush1.bf16.msra.mxu1 %v3317_v60  ;;  %3015 = vmatpush3.bf16.msra.mxu0 %v3321_v61  ;;  %v3435_v60 = vmov 0.0  }
 0x13e   :  { %1889 = vmatprep.subr.bf16.mxu1 %v3324_v62  ;;  %3016 = vmatprep.subr.bf16.mxu0 %v3325_v63 }
 0x141   :  { %1890 = vmatpush1.bf16.msra.mxu1 %v3322_v0  ;;  %3017 = vmatpush3.bf16.msra.mxu0 %v3326_v1  ;;  %v3397_v1 = vld [vmem:[%s4305_s5 + $0x120] sm:$0xff]  }
 0x142   :  { %1891 = vmatprep.subr.bf16.mxu1 %v3329_v2  ;;  %3018 = vmatprep.subr.bf16.mxu0 %v3330_v3  ;;  %v3398_v2 = vld [vmem:[%s4305_s5 + $0x128] sm:$0x3f]  }
 0x143   :  { %v2246_v3 = vsel %vm2244_vm1, %v3398_v2, 0 }
 0x145   :  { %1892 = vmatpush1.bf16.msra.mxu1 %v3327_v4  ;;  %3019 = vmatpush3.bf16.msra.mxu0 %v3331_v5  ;;  %v3399_v4 = vld [vmem:[%s4305_s5 + $0xd8] sm:$0xff]  }
 0x146   :  { %1904 = vmatprep.subr.bf16.mxu1 %v3334_v7  ;;  %3026 = vmatprep.subr.bf16.mxu0 %v3335_v10  ;;  %v3400_v5 = vld [vmem:[%s4305_s5 + $0x98] sm:$0xff]   ;;  %v3401_v7 = vld [vmem:[%s4305_s5 + $0x40] sm:$0xff]  }
 0x147   :  { %v3403_v10 = vld [vmem:[%s4305_s5 + $0xe0] sm:$0xff]  }
 0x148   :  { %1894 = vmatmul.mubr.bf16.vlgmr.msra.gmra.mrb[16].mxu1 %v3719_v35  ;;  %1980 = vmatmul.mubr.bf16.vlgmr.msra.gmra.mrb[12].mxu0 %v3719_v35  ;;  %v3345_v35 = vld [vmem:[%s4303_s3 + $0x578] ss:$12 sps:$4 sm:$0xff]  }
 0x149   :  { %1905 = vmatpush1.bf16.msra.mxu1 %v3332_v11  ;;  %3027 = vmatpush3.bf16.msra.mxu0 %v3336_v13  ;;  %v3404_v11 = vld [vmem:[%s4305_s5 + $0xa0] sm:$0xff]   ;;  %v3407_v13 = vld [vmem:[%s4305_s5 + $0xe8] sm:$0xff]  }
 0x14a   :  { %1906 = vmatprep.subr.bf16.mxu1 %v3339_v14  ;;  %3028 = vmatprep.subr.bf16.mxu0 %v3340_v15  ;;  %v3408_v14 = vld [vmem:[%s4305_s5 + $0xa8] sm:$0xff]   ;;  %v3411_v15 = vld [vmem:[%s4305_s5 + $0xf0] sm:$0xff]  }
 0x14b   :  { %2020 = vmatprep.mubr.bf16.mxu0 %v3741_v49  ;;  %1936 = vmatprep.mubr.bf16.mxu1 %v3741_v49  ;;  %v3350_v49 = vld [vmem:[%s4303_s3 + $0x590] ss:$12 sps:$4 sm:$0xff]  }
 0x14d   :  { %1907 = vmatpush1.bf16.msra.mxu1 %v3337_v16  ;;  %3029 = vmatpush3.bf16.msra.mxu0 %v3341_v17  ;;  %v3412_v16 = vld [vmem:[%s4305_s5 + $0xb0] sm:$0xff]   ;;  %v3415_v17 = vld [vmem:[%s4305_s5 + $0xf8] sm:$0xff]  }
 0x14e   :  { %1908 = vmatprep.subr.bf16.mxu1 %v3344_v18  ;;  %3030 = vmatprep.subr.bf16.mxu0 %v3345_v35  ;;  %v3416_v18 = vld [vmem:[%s4305_s5 + $0xb8] sm:$0xff]   ;;  %v484_v35 = vld [vmem:[%s4306_s4] sm:$0x7] }
 0x151   :  { %1909 = vmatpush1.bf16.msra.mxu1 %v3342_v19  ;;  %3031 = vmatpush3.bf16.msra.mxu0 %v3346_v20  ;;  %v497_v19 = vrot.slane %v484_v35, %v3665_v9  ;;  %v3419_v20 = vld [vmem:[%s4305_s5 + $0x100] sm:$0xff]  }
 0x152   :  { %1910 = vmatprep.subr.bf16.mxu1 %v3349_v21  ;;  %3032 = vmatprep.subr.bf16.mxu0 %v3350_v49  ;;  %v3420_v21 = vld [vmem:[%s4305_s5 + $0xc0] sm:$0xff]  }
 0x155   :  { %1911 = vmatpush1.bf16.msra.mxu1 %v3347_v22  ;;  %3033 = vmatpush3.bf16.msra.mxu0 %v3351_v23 }
 0x156   :  { %1912 = vmatprep.subr.bf16.mxu1 %v3354_v24  ;;  %3034 = vmatprep.subr.bf16.mxu0 %v3355_v25 }
 0x159   :  { %1913 = vmatpush1.bf16.msra.mxu1 %v3352_v29  ;;  %3035 = vmatpush3.bf16.msra.mxu0 %v3356_v30  ;;  %v3423_v29 = vld [vmem:[%s4305_s5 + $0x108] sm:$0xff]  }
 0x15a   :  { %1914 = vmatprep.subr.bf16.mxu1 %v3359_v31  ;;  %3036 = vmatprep.subr.bf16.mxu0 %v3360_v32  ;;  %v3424_v31 = vld [vmem:[%s4305_s5 + $0xc8] sm:$0xff]  }
 0x15d   :  { %1915 = vmatpush1.bf16.msra.mxu1 %v3357_v26  ;;  %3037 = vmatpush3.bf16.msra.mxu0 %v3361_v33 }
 0x15e   :  { %1916 = vmatprep.subr.bf16.mxu1 %v3364_v34  ;;  %3038 = vmatprep.subr.bf16.mxu0 %v3365_v27 }
 0x161   :  { %1917 = vmatpush1.bf16.msra.mxu1 %v3362_v36  ;;  %3039 = vmatpush3.bf16.msra.mxu0 %v3366_v37  ;;  %v3427_v36 = vld [vmem:[%s4305_s5 + $0x110] sm:$0xff]  }
 0x162   :  { %1918 = vmatprep.subr.bf16.mxu1 %v3369_v38  ;;  %3040 = vmatprep.subr.bf16.mxu0 %v3370_v28  ;;  %v3428_v37 = vld [vmem:[%s4305_s5 + $0xd0] sm:$0xff]  }
 0x165   :  { %1919 = vmatpush1.bf16.msra.mxu1 %v3367_v40  ;;  %3041 = vmatpush3.bf16.msra.mxu0 %v3371_v41 }
 0x166   :  { %1920 = vmatprep.subr.bf16.mxu1 %v3374_v42  ;;  %3048 = vmatprep.subr.bf16.mxu0 %v3399_v4  ;;  %v3433_v42 = vld [vmem:[%s4305_s5 + $0x90] sm:$0x3f]  }
 0x168   :  { %2021 = vmatmul.mubr.bf16.vlgmr.msra.gmra.mrb[16].mxu0 %v3733_v45 }
 0x169   :  { %1921 = vmatpush1.bf16.msra.mxu1 %v3372_v43  ;;  %3049 = vmatpush3.bf16.msra.mxu0 %v3400_v5  ;;  %v4212_v43 = vsel %vm2244_vm1, %v3433_v42, 0  ;;  %v3425_v42 = vld [vmem:[%s4305_s5 + $0x70] sm:$0xff]  }
 0x16a   :  { %1922 = vmatprep.subr.bf16.mxu1 %v3377_v44  ;;  %3050 = vmatprep.subr.bf16.mxu0 %v3403_v10  ;;  %v489_v44 = vrot.slane %v484_v35, %v3658_v6 }
 0x16d   :  { %1923 = vmatpush1.bf16.msra.mxu1 %v3375_v46  ;;  %3051 = vmatpush3.bf16.msra.mxu0 %v3404_v11  ;;  %v493_v46 = vrot.slane %v484_v35, %v3663_v8 }
 0x16e   :  { %1924 = vmatprep.subr.bf16.mxu1 %v3380_v47  ;;  %3052 = vmatprep.subr.bf16.mxu0 %v3407_v13 }
 0x171   :  { %1925 = vmatpush1.bf16.msra.mxu1 %v3378_v12  ;;  %3053 = vmatpush3.bf16.msra.mxu0 %v3408_v14 }
 0x172   :  { %1926 = vmatprep.subr.bf16.mxu1 %v3383_v48  ;;  %3054 = vmatprep.subr.bf16.mxu0 %v3411_v15 }
 0x175   :  { %1927 = vmatpush1.bf16.msra.mxu1 %v3381_v50  ;;  %3055 = vmatpush3.bf16.msra.mxu0 %v3412_v16 }
 0x176   :  { %1928 = vmatprep.subr.bf16.mxu1 %v3386_v51  ;;  %3056 = vmatprep.subr.bf16.mxu0 %v3415_v17 }
 0x179   :  { %1929 = vmatpush1.bf16.msra.mxu1 %v3384_v39  ;;  %3057 = vmatpush3.bf16.msra.mxu0 %v3416_v18 }
 0x17a   :  { %1930 = vmatprep.subr.bf16.mxu1 %v3389_v52  ;;  %3058 = vmatprep.subr.bf16.mxu0 %v3419_v20 }
 0x17d   :  { %1931 = vmatpush1.bf16.msra.mxu1 %v3387_v53  ;;  %3059 = vmatpush3.bf16.msra.mxu0 %v3420_v21 }
 0x17e   :  { %1932 = vmatprep.subr.bf16.mxu1 %v3392_v54  ;;  %3060 = vmatprep.subr.bf16.mxu0 %v3423_v29  ;;  %v3406_v29 = vld [vmem:[%s4305_s5 + $0x8] sm:$0xff]  }
 0x181   :  { %1933 = vmatpush1.bf16.msra.mxu1 %v3390_v55  ;;  %3061 = vmatpush3.bf16.msra.mxu0 %v3424_v31  ;;  %v3410_v31 = vld [vmem:[%s4305_s5 + $0x10] sm:$0xff]  }
 0x182   :  { %1934 = vmatprep.subr.bf16.mxu1 %v3395_v56  ;;  %3062 = vmatprep.subr.bf16.mxu0 %v3427_v36 }
 0x185   :  { %1935 = vmatpush1.bf16.msra.mxu1 %v3393_v57  ;;  %3063 = vmatpush3.bf16.msra.mxu0 %v3428_v37 }
 0x186   :  { %3100 = vmatprep.subr.bf16.mxu1 %v3435_v60  ;;  %3110 = vmatprep.subr.bf16.mxu0 %v3435_v60 }
 0x188   :  { %1937 = vmatmul.mubr.bf16.vlgmr.msra.gmra.mrb[16].mxu1 %v3733_v45 }
 0x189   :  { %3101 = vmatpush3.bf16.msra.mxu1 %v3396_v58  ;;  %3106 = vmatprep.mubr.msk.bf16.mxu1 %vm3436_vm2, %v3435_v60 }
 0x18a   :  { %3102 = vmatprep.subr.bf16.mxu1 %v3435_v60 }
 0x18d   :  { %3103 = vmatpush3.bf16.msra.mxu1 %v3397_v1 }
 0x18e   :  { %3104 = vmatprep.subr.bf16.mxu1 %v3435_v60 }
 0x191   :  { %3105 = vmatpush3.bf16.msra.mxu1 %v2246_v3 }
 0x192   :  { %3074 = vmatprep.subr.bf16.mxu1 %v3401_v7  ;;  %v2784_v7 = vld [vmem:[%s4306_s4 + $0x3] sm:$0x7] }
 0x193   :  { %v1345_v10 = vrot.slane %v2784_v7, %v3665_v9  ;;  %v3402_v9 = vld [vmem:[%s4305_s5] sm:$0xff]   ;;  %v1337_v36 = vrot.slane %v2784_v7, %v3658_v6  ;;  %v1341_v37 = vrot.slane %v2784_v7, %v3663_v8  ;;  %v3426_v6 = vld [vmem:[%s4305_s5 + $0x30] sm:$0xff]  }
 0x1bb   :  { %v2976_v59 = vpop.f32.mrb[8].mxu1 }
 0x1bc   :  { %v2977_v61 = vpop.f32.mrb[9].mxu1 }
 0x1bd   :  { %v2978_v62 = vadd.f32 %v2977_v61, %v2976_v59  ;;  %v2979_v63 = vpop.f32.mrb[10].mxu1 }
 0x1be   :  { %v2980_v0 = vpop.f32.mrb[11].mxu1 }
 0x1bf   :  { %v2981_v45 = vadd.f32 %v2980_v0, %v2979_v63  ;;  %v1134_v23 = vadd.f32 %v2978_v62, %v497_v19 }
 0x1c1   :  { %v1137_v32 = vadd.f32 %v2981_v45, %v497_v19 }
 0x1db   :  { %v2998_v49 = vpop.f32.mrb[12].mxu1 }
 0x1dc   :  { %v2999_v22 = vpop.f32.mrb[13].mxu1 }
 0x1dd   :  { %v3000_v24 = vadd.f32 %v2999_v22, %v2998_v49  ;;  %v3001_v25 = vpop.f32.mrb[14].mxu1 }
 0x1de   :  { %v3002_v30 = vpop.f32.mrb[15].mxu1 }
 0x1df   :  { %v1175_v26 = vadd.f32 %v3000_v24, %v1134_v23  ;;  %v3003_v33 = vadd.f32 %v3002_v30, %v3001_v25  ;;  %v3405_v25 = vld [vmem:[%s4305_s5 + $0x48] sm:$0xff]   ;;  %v3409_v30 = vld [vmem:[%s4305_s5 + $0x50] sm:$0xff]  }
 0x1e1   :  { %v1189_v34 = vmul.f32 0.01, %v1175_v26  ;;  %v1178_v27 = vadd.f32 %v3003_v33, %v1137_v32  ;;  %vm1183_vm3 = vcmp.gt.f32.partialorder %v1175_v26, 0.0  ;;  %v3413_v32 = vld [vmem:[%s4305_s5 + $0x58] sm:$0xff]   ;;  %v3417_v33 = vld [vmem:[%s4305_s5 + $0x60] sm:$0xff]  }
 0x1e3   :  { %vm1186_vm4 = vcmp.gt.f32.partialorder %v1178_v27, 0.0  ;;  %v1192_v38 = vmul.f32 0.01, %v1178_v27  ;;  %v4201_v28 = vsel %vm1183_vm3, %v1175_v26, %v1189_v34  ;;  %v3414_v26 = vld [vmem:[%s4305_s5 + $0x18] sm:$0xff]   ;;  %v3418_v34 = vld [vmem:[%s4305_s5 + $0x20] sm:$0xff]  }
 0x1e5   :  { %v4203_v40 = vsel %vm1186_vm4, %v1178_v27, %v1192_v38  ;;  %v3421_v27 = vld [vmem:[%s4305_s5 + $0x68] sm:$0xff]  }
 0x1e6   :  { %v1201_v41 = vpack.c.bf16 %v4203_v40, %v4201_v28  ;;  %v3422_v38 = vld [vmem:[%s4305_s5 + $0x28] sm:$0xff]  }
 0x1fb   :  { %v1090_v47 = vpop.f32.mrb[8].mxu0 }
 0x1fc   :  { %v3120_v12 = vadd.f32 %v1090_v47, %v489_v44  ;;  %v1092_v48 = vpop.f32.mrb[9].mxu0 }
 0x1fd   :  { %v3121_v50 = vadd.f32 %v1092_v48, %v493_v46  ;;  %v1094_v51 = vpop.f32.mrb[10].mxu0 }
 0x1fe   :  { %v1187_v39 = vmul.f32 0.01, %v3120_v12  ;;  %v3122_v52 = vadd.f32 %v1094_v51, %v489_v44  ;;  %v1096_v53 = vpop.f32.mrb[11].mxu0  ;;  %vm1181_vm5 = vcmp.gt.f32.partialorder %v3120_v12, 0.0 }
 0x1ff   :  { %v1188_v54 = vmul.f32 0.01, %v3121_v50  ;;  %v3123_v55 = vadd.f32 %v1096_v53, %v493_v46  ;;  %vm1182_vm6 = vcmp.gt.f32.partialorder %v3121_v50, 0.0 }
 0x200   :  { %vm1184_vm7 = vcmp.gt.f32.partialorder %v3122_v52, 0.0  ;;  %v1190_v56 = vmul.f32 0.01, %v3122_v52  ;;  %v4216_v58 = vsel %vm1181_vm5, %v3120_v12, %v1187_v39  ;;  %v3429_v39 = vld [vmem:[%s4305_s5 + $0x78] sm:$0xff]  }
 0x201   :  { %vm1185_vm8 = vcmp.gt.f32.partialorder %v3123_v55, 0.0  ;;  %v1191_v57 = vmul.f32 0.01, %v3123_v55  ;;  %v1194_v62 = vsel %vm1182_vm6, %v3121_v50, %v1188_v54 }
 0x202   :  { %v4218_v59 = vsel %vm1184_vm7, %v3122_v52, %v1190_v56  ;;  %v3430_v56 = vld [vmem:[%s4305_s5 + $0x38] sm:$0xff]  }
 0x203   :  { %v1199_v61 = vpack.c.bf16 %v4218_v59, %v4216_v58  ;;  %v1197_v63 = vsel %vm1185_vm8, %v3123_v55, %v1191_v57 }
 0x204   :  { %v1200_v0 = vpack.c.bf16 %v1197_v63, %v1194_v62 }
 0x21b   :  { %v3020_v1 = vpop.f32.mrb[12].mxu0 }
 0x21c   :  { %v3021_v45 = vpop.f32.mrb[13].mxu0 }
 0x21d   :  { %v3022_v2 = vadd.f32 %v3021_v45, %v3020_v1  ;;  %v3023_v3 = vpop.f32.mrb[14].mxu0 }
 0x21e   :  { %v3024_v4 = vpop.f32.mrb[15].mxu0 }
 0x21f   :  { %v3025_v5 = vadd.f32 %v3024_v4, %v3023_v3  ;;  %v1982_v14 = vadd.f32 %v3022_v2, %v1345_v10  ;;  %v3431_v2 = vld [vmem:[%s4305_s5 + $0x80] sm:$0xff]   ;;  %v3432_v3 = vld [vmem:[%s4305_s5 + $0x88] sm:$0xff]  }
 0x221   :  { %v1985_v18 = vadd.f32 %v3025_v5, %v1345_v10 }
 0x23b   :  { %v3042_v11 = vpop.f32.mrb[16].mxu0 }
 0x23c   :  { %v3043_v13 = vpop.f32.mrb[17].mxu0 }
 0x23d   :  { %v3044_v15 = vadd.f32 %v3043_v13, %v3042_v11  ;;  %v3045_v16 = vpop.f32.mrb[18].mxu0 }
 0x23e   :  { %v3046_v17 = vpop.f32.mrb[19].mxu0 }
 0x23f   :  { %v2023_v35 = vadd.f32 %v3044_v15, %v1982_v14  ;;  %v3047_v19 = vadd.f32 %v3046_v17, %v3045_v16 }
 0x241   :  { %v2037_v20 = vmul.f32 0.01, %v2023_v35  ;;  %v2026_v21 = vadd.f32 %v3047_v19, %v1985_v18  ;;  %vm2031_vm9 = vcmp.gt.f32.partialorder %v2023_v35, 0.0 }
 0x243   :  { %vm2034_vm10 = vcmp.gt.f32.partialorder %v2026_v21, 0.0  ;;  %v2040_v49 = vmul.f32 0.01, %v2026_v21  ;;  %v2043_v22 = vsel %vm2031_vm9, %v2023_v35, %v2037_v20  ;;  %v2959_v20 = vld [vmem:[%s4307_s6] ss:$0 sm:$0xff] }
 0x245   :  { %v2046_v23 = vsel %vm2034_vm10, %v2026_v21, %v2040_v49 }
 0x246   :  { %v2049_v24 = vpack.c.bf16 %v2046_v23, %v2043_v22 }
 0x248   :  { %3107 = vmatmul.mubr.msk.bf16.vlgmr.msra.gmra.mrb[20].mxu1 %vm2240_vm11, %v2049_v24 }
 0x249   :  { %3075 = vmatpush3.bf16.msra.mxu1 %v3402_v9  ;;  %2481 = vmatprep.mubr.bf16.mxu1 %v1200_v0 }
 0x24a   :  { %3076 = vmatprep.subr.bf16.mxu1 %v3405_v25 }
 0x24d   :  { %3077 = vmatpush3.bf16.msra.mxu1 %v3406_v29 }
 0x24e   :  { %3078 = vmatprep.subr.bf16.mxu1 %v3409_v30 }
 0x251   :  { %3079 = vmatpush3.bf16.msra.mxu1 %v3410_v31 }
 0x252   :  { %3080 = vmatprep.subr.bf16.mxu1 %v3413_v32 }
 0x255   :  { %3081 = vmatpush3.bf16.msra.mxu1 %v3414_v26 }
 0x256   :  { %3082 = vmatprep.subr.bf16.mxu1 %v3417_v33 }
 0x259   :  { %3083 = vmatpush3.bf16.msra.mxu1 %v3418_v34 }
 0x25a   :  { %3084 = vmatprep.subr.bf16.mxu1 %v3421_v27 }
 0x25b   :  { %v1938_v44 = vpop.f32.mrb[16].mxu1 }
 0x25c   :  { %v3124_v46 = vadd.f32 %v1938_v44, %v1337_v36  ;;  %v1940_v47 = vpop.f32.mrb[17].mxu1 }
 0x25d   :  { %v3125_v12 = vadd.f32 %v1940_v47, %v1341_v37  ;;  %3085 = vmatpush3.bf16.msra.mxu1 %v3422_v38  ;;  %v1942_v48 = vpop.f32.mrb[18].mxu1 }
 0x25e   :  { %v2035_v8 = vmul.f32 0.01, %v3124_v46  ;;  %v3126_v50 = vadd.f32 %v1942_v48, %v1337_v36  ;;  %v1944_v51 = vpop.f32.mrb[19].mxu1  ;;  %3086 = vmatprep.subr.bf16.mxu1 %v3425_v42  ;;  %vm2029_vm12 = vcmp.gt.f32.partialorder %v3124_v46, 0.0 }
 0x25f   :  { %v2036_v52 = vmul.f32 0.01, %v3125_v12  ;;  %v3127_v53 = vadd.f32 %v1944_v51, %v1341_v37  ;;  %vm2030_vm13 = vcmp.gt.f32.partialorder %v3125_v12, 0.0 }
 0x260   :  { %vm2032_vm14 = vcmp.gt.f32.partialorder %v3126_v50, 0.0  ;;  %v2038_v54 = vmul.f32 0.01, %v3126_v50  ;;  %v2041_v57 = vsel %vm2029_vm12, %v3124_v46, %v2035_v8 }
 0x261   :  { %vm2033_vm15 = vcmp.gt.f32.partialorder %v3127_v53, 0.0  ;;  %v2039_v55 = vmul.f32 0.01, %v3127_v53  ;;  %3087 = vmatpush3.bf16.msra.mxu1 %v3426_v6  ;;  %v2042_v0 = vsel %vm2030_vm13, %v3125_v12, %v2036_v52 }
 0x262   :  { %v2044_v62 = vsel %vm2032_vm14, %v3126_v50, %v2038_v54  ;;  %3088 = vmatprep.subr.bf16.mxu1 %v3429_v39 }
 0x263   :  { %v2047_v63 = vpack.c.bf16 %v2044_v62, %v2041_v57  ;;  %v2045_v1 = vsel %vm2033_vm15, %v3127_v53, %v2039_v55 }
 0x264   :  { %v2048_v45 = vpack.c.bf16 %v2045_v1, %v2042_v0 }
 0x265   :  { %3089 = vmatpush3.bf16.msra.mxu1 %v3430_v56 }
 0x266   :  { %2280 = vmatprep.mubr.bf16.mxu0 %v2048_v45 }
 0x267   :  { %2281 = vmatmul.mubr.bf16.vlgmr.msra.gmra.mrb[20].mxu0 %v2047_v63 }
 0x268   :  { %2482 = vmatmul.mubr.bf16.vlgmr.msra.gmra.mrb[24].mxu1 %v1199_v61  ;;  %3111 = vmatpush3.bf16.msra.mxu0 %v3431_v2 }
 0x269   :  { %3112 = vmatprep.subr.bf16.mxu0 %v3435_v60  ;;  %3116 = vmatprep.mubr.msk.bf16.mxu0 %vm3436_vm2, %v3435_v60 }
 0x26c   :  { %3113 = vmatpush3.bf16.msra.mxu0 %v3432_v3 }
 0x26d   :  { %3114 = vmatprep.subr.bf16.mxu0 %v3435_v60 }
 0x270   :  { %3115 = vmatpush3.bf16.msra.mxu0 %v4212_v43 }
 0x273   :  { %3117 = vmatmul.mubr.msk.bf16.vlgmr.msra.gmra.mrb[24].mxu0 %vm2240_vm11, %v1201_v41 }
 0x31b   :  { %v2323_v58 = vpop.f32.mrb[20].mxu1 }
 0x31c   :  { %v3108_v59 = vpop.f32.mrb[21].mxu1 }
 0x31d   :  { %v2326_v61 = vpop.f32.mrb[22].mxu1 }
 0x31e   :  { %v3109_v4 = vpop.f32.mrb[23].mxu1 }
 0x33a   :  { %v3064_v5 = vpop.f32.mrb[20].mxu0 }
 0x33b   :  { %v3090_v7 = vpop.f32.mrb[24].mxu1  ;;  %v3065_v10 = vpop.f32.mrb[21].mxu0 }
 0x33c   :  { %v3066_v11 = vadd.f32 %v3065_v10, %v3064_v5  ;;  %v3091_v13 = vpop.f32.mrb[25].mxu1  ;;  %v3067_v14 = vpop.f32.mrb[22].mxu0 }
 0x33d   :  { %v3092_v15 = vadd.f32 %v3091_v13, %v3090_v7  ;;  %v3093_v16 = vpop.f32.mrb[26].mxu1  ;;  %v3068_v60 = vpop.f32.mrb[23].mxu0 }
 0x33e   :  { %v2324_v17 = vadd.f32 %v3066_v11, %v2323_v58  ;;  %v3069_v43 = vadd.f32 %v3068_v60, %v3067_v14  ;;  %v3094_v18 = vpop.f32.mrb[27].mxu1 }
 0x33f   :  { %v3095_v35 = vadd.f32 %v3094_v18, %v3093_v16 }
 0x340   :  { %v2327_v28 = vadd.f32 %v3069_v43, %v2326_v61  ;;  %v2484_v40 = vadd.f32 %v3092_v15, %v2324_v17 }
 0x342   :  { %v2487_v41 = vadd.f32 %v3095_v35, %v2327_v28 }
 0x346   :  { %v2524_v19 = vpop.f32.mrb[24].mxu0 }
 0x347   :  { %v2525_v21 = vadd.f32 %v2524_v19, %v2484_v40  ;;  %v3118_v49 = vpop.f32.mrb[25].mxu0 }
 0x348   :  { %v2527_v22 = vpop.f32.mrb[26].mxu0 }
 0x349   :  { %v2538_v23 = vadd.f32 %v2959_v20, %v2525_v21  ;;  %v2528_v9 = vadd.f32 %v2527_v22, %v2487_v41  ;;  %v3119_v24 = vpop.f32.mrb[27].mxu0 }
 0x34b   :  { %2541 = vst.msk [vmem:[%s4308_s7] sm:$0xff] %vm2540_vm0, %v2538_v23  ;;  %v2539_v25 = vadd.f32 %v2959_v20, %v2528_v9 }
 0x34d   :  { %2542 = vst.msk [vmem:[%s4308_s7 + $0x8] sm:$0xff] %vm2540_vm0, %v2539_v25 }

</bundles_post_ra>
